<compile_context>
chip_gen: v7x
topology: tpu7x:2x2x1
jax: 0.10.0
libtpu: 0.0.40
codegen_flags: <defaults>
</compile_context>

<pallas_src>
import functools

import jax
import jax.numpy as jnp
from jax.experimental import pallas as pl
from jax.experimental.pallas import tpu as pltpu


def _round_up(x, m):
    return ((x + m - 1) // m) * m


# --------------------------------------------------------------------------
# Pallas kernel: WB windows per grid step.
# --------------------------------------------------------------------------
def _window_attn_kernel(x_ref, wqkv_ref, bqkv_ref, relbias_ref,
                        wproj_ref, bproj_ref, o_ref, *,
                        num_heads, num_windows, tokens, head_dim, channels,
                        compute_dtype, approx_recip):
    # x_ref:       (rows=WB*Np, Cp)  activation slab (compute dtype)
    # wqkv_ref:    (Cp, 3C)          fused qkv weight (scale folded into q cols)
    # bqkv_ref:    (1, 3C)           fused qkv bias (f32, scale folded)
    # relbias_ref: (H, Np, Np)       rel-pos bias, padded key cols pre-masked
    # wproj_ref:   (C, Cout)         output projection weight
    # bproj_ref:   (1, Cout)         output projection bias (f32)
    # o_ref:       (rows, Cout)
    f32 = jnp.float32
    H, WB, Np, hd, C = num_heads, num_windows, tokens, head_dim, channels
    rows = WB * Np

    xf = x_ref[...]                                            # (rows, Cp)

    # Fused QKV projection: a single lane-dense MXU matmul, output width 3C.
    qkv = jnp.dot(xf, wqkv_ref[...], preferred_element_type=f32) + bqkv_ref[...]

    rel = relbias_ref[...]                                     # (H, Np, Np) f32

    # TODO(synk): for very large num_heads switch this static unroll to
    # lax.fori_loop writing head slices into a VMEM ctx scratch to bound live
    # ranges (blocked today on dynamic lane-offset stores).
    ctx_parts = []
    for h in range(H):
        # Static hd-wide lane slices; tiny XLU/copy cost vs. the fused-matmul
        # MXU savings, and on a different VLIW slot.
        q = qkv[:, h * hd:(h + 1) * hd]
        k = qkv[:, C + h * hd:C + (h + 1) * hd]
        v = qkv[:, 2 * C + h * hd:2 * C + (h + 1) * hd]
        q = q.astype(compute_dtype).reshape(WB, Np, hd)
        k = k.astype(compute_dtype).reshape(WB, Np, hd)
        v = v.astype(compute_dtype).reshape(WB, Np, hd)

        # Scaled scores (scale already folded into Wq/bq), batched over windows.
        s = jnp.einsum('wnd,wmd->wnm', q, k, preferred_element_type=f32)
        s = s + rel[h]                       # padded keys already at -1e9 here

        # Softmax in f32; casts only at MXU boundaries (v5e has no bf16 VPU).
        s = s - jnp.max(s, axis=-1, keepdims=True)
        p = jnp.exp(s)
        p = p * pl.reciprocal(jnp.sum(p, axis=-1, keepdims=True),
                              approx=approx_recip)

        ctx = jnp.einsum('wnm,wmd->wnd', p.astype(compute_dtype), v,
                         preferred_element_type=f32)           # (WB, Np, hd)
        ctx_parts.append(ctx.reshape(rows, hd).astype(compute_dtype))

    # Fused output projection across all heads: contraction depth = C.
    ctx_all = jnp.concatenate(ctx_parts, axis=-1)              # (rows, C)
    out = jnp.dot(ctx_all, wproj_ref[...], preferred_element_type=f32)
    out = out + bproj_ref[...]
    o_ref[...] = out.astype(o_ref.dtype)


# --------------------------------------------------------------------------
# Relative position index (identical to the PyTorch buffer construction).
# --------------------------------------------------------------------------
def make_relative_position_index(window_size):
    Wh, Ww = window_size
    coords = jnp.stack(jnp.meshgrid(jnp.arange(Wh), jnp.arange(Ww),
                                    indexing='ij'))                    # (2,Wh,Ww)
    coords_flat = coords.reshape(2, -1)                                # (2, N)
    rel = coords_flat[:, :, None] - coords_flat[:, None, :]            # (2, N, N)
    rel = jnp.transpose(rel, (1, 2, 0))                                # (N, N, 2)
    rel = rel.at[:, :, 0].add(Wh - 1)
    rel = rel.at[:, :, 1].add(Ww - 1)
    rel = rel.at[:, :, 0].multiply(2 * Ww - 1)
    return rel.sum(-1)                                                 # (N, N)


# --------------------------------------------------------------------------
# One-time parameter preprocessing (call once per layer, NOT per forward).
# --------------------------------------------------------------------------
def prepare_window_attention_params(params, window_size, num_heads, *,
                                    compute_dtype=jnp.bfloat16, qk_scale=None):
    f32 = jnp.float32
    C = params['proj_w'].shape[0]
    H = num_heads
    assert C % H == 0, "dim must be divisible by num_heads"
    hd = C // H
    scale = qk_scale if qk_scale is not None else hd ** (-0.5)
    Wh, Ww = window_size
    N = Wh * Ww
    Np = _round_up(N, 8)                 # token padding (7x7 -> 49 -> 56)
    Cp = _round_up(C, 128)               # lane-dense channel padding
    Cout = C if C % 128 == 0 else Cp     # lanes actually written to HBM

    qkv_w = params['qkv_w'].astype(f32)  # (3C, C)
    qkv_b = params['qkv_b'].astype(f32)  # (3C,)

    # Fold the qk scale into the q columns (deletes an in-kernel multiply).
    col_scale = jnp.concatenate([jnp.full((C,), scale, f32),
                                 jnp.ones((2 * C,), f32)])
    wqkv = qkv_w.T * col_scale[None, :]                        # (C, 3C)
    wqkv = jnp.pad(wqkv, ((0, Cp - C), (0, 0))).astype(compute_dtype)
    bqkv = (qkv_b * col_scale).reshape(1, 3 * C).astype(f32)

    # Relative position bias (H, Np, Np); padded key columns masked to -1e9 so
    # the kernel gets key masking "for free" via the existing bias add.
    rel_index = make_relative_position_index(window_size)      # (N, N)
    rb = params['rel_bias_table'].astype(f32)[rel_index.reshape(-1)]
    rb = rb.reshape(N, N, H).transpose(2, 0, 1)                # (H, N, N)
    rb = jnp.pad(rb, ((0, 0), (0, Np - N), (0, Np - N)))
    if Np > N:
        rb = rb.at[:, :, N:].set(-1e9)

    # TODO(synk): on v7x, optionally quantize wqkv/wproj to fp8 (bf16 acts,
    # f32 accumulation) for ~2x MXU throughput on the projections.
    wproj = jnp.pad(params['proj_w'].astype(f32).T,
                    ((0, 0), (0, Cout - C))).astype(compute_dtype)      # (C, Cout)
    bproj = jnp.pad(params['proj_b'].astype(f32),
                    (0, Cout - C)).reshape(1, Cout)

    return dict(wqkv=wqkv, bqkv=bqkv, rel_bias=rb, wproj=wproj, bproj=bproj,
                C=C, Cp=Cp, Cout=Cout, N=N, Np=Np, H=H, hd=hd,
                compute_dtype=compute_dtype)


# --------------------------------------------------------------------------
# Per-call wrapper.
# --------------------------------------------------------------------------
def window_attention(x, prepared, *, rows_per_block=1024, out_dtype=None):
    """Forward of WindowAttention (mask=None path). x: (B_, N, C)."""
    B_, N, C = x.shape
    assert N == prepared['N'] and C == prepared['C']
    H, hd = prepared['H'], prepared['hd']
    Np, Cp, Cout = prepared['Np'], prepared['Cp'], prepared['Cout']
    compute_dtype = prepared['compute_dtype']
    out_dtype = x.dtype if out_dtype is None else out_dtype

    # v7x has only 64 MiB VMEM per TensorCore: shrink the row block for wide
    # channel counts so slabs + weights + temporaries stay inside budget.
    if Cp >= 768:
        rows_per_block = min(rows_per_block, 512)

    # Window batch per grid step; cap so there are >= 2 grid steps whenever
    # B_ >= 2 (v7x has 2 TensorCores sharding the "parallel" axis).
    WB = max(1, min(rows_per_block // Np, (B_ + 1) // 2))
    B_pad = _round_up(B_, WB)
    num_blocks = B_pad // WB
    ROWS = WB * Np

    # Activation slab: pad windows / tokens / channels, flatten to lane-dense 2-D.
    xp = jnp.pad(x, ((0, B_pad - B_), (0, Np - N), (0, Cp - C)))
    x2d = xp.reshape(B_pad * Np, Cp).astype(compute_dtype)

    kernel = functools.partial(
        _window_attn_kernel,
        num_heads=H, num_windows=WB, tokens=Np, head_dim=hd, channels=C,
        compute_dtype=compute_dtype,
        approx_recip=(compute_dtype != jnp.float32))

    cdt_bytes = jnp.dtype(compute_dtype).itemsize
    out_bytes = jnp.dtype(out_dtype).itemsize

    def vmem_limit(weight_bufs):
        est = 2 * ROWS * Cp * cdt_bytes                     # x slab (double buffered)
        est += 2 * ROWS * Cout * out_bytes                  # out slab (double buffered)
        est += weight_bufs * (Cp * 3 * C * cdt_bytes + 3 * C * 4
                              + H * Np * Np * 4
                              + C * Cout * cdt_bytes + Cout * 4)
        est += ROWS * (3 * C + C + Cout) * 4                # qkv / ctx / out temporaries
        est += 4 * WB * Np * Np * 4                         # live score tiles
        est = int(est * 1.5) + (4 << 20)
        return max(32 << 20, min(est, 64 << 20))

    def build(single_buffer_consts):
        def const_spec(shape):
            nd = len(shape)
            imap = lambda b: (0,) * nd
            if single_buffer_consts:
                # Grid-invariant operands: double-buffering them only wastes VMEM.
                return pl.BlockSpec(shape, imap, pipeline_mode=pl.Buffered(1))
            return pl.BlockSpec(shape, imap)

        return pl.pallas_call(
            kernel,
            out_shape=jax.ShapeDtypeStruct((B_pad * Np, Cout), out_dtype),
            grid_spec=pltpu.PrefetchScalarGridSpec(
                num_scalar_prefetch=0,
                grid=(num_blocks,),
                in_specs=[
                    pl.BlockSpec((ROWS, Cp), lambda b: (b, 0)),     # x slab
                    const_spec((Cp, 3 * C)),                        # wqkv
                    const_spec((1, 3 * C)),                         # bqkv
                    const_spec((H, Np, Np)),                        # rel bias
                    const_spec((C, Cout)),                          # wproj
                    const_spec((1, Cout)),                          # bproj
                ],
                out_specs=pl.BlockSpec((ROWS, Cout), lambda b: (b, 0)),
            ),
            compiler_params=pltpu.CompilerParams(
                dimension_semantics=("parallel",),
                vmem_limit_bytes=vmem_limit(1 if single_buffer_consts else 2)),
        )

    args = (x2d, prepared['wqkv'], prepared['bqkv'], prepared['rel_bias'],
            prepared['wproj'], prepared['bproj'])
    try:
        out2d = build(single_buffer_consts=True)(*args)
    except Exception:
        # Fallback for JAX versions where BlockSpec(pipeline_mode=Buffered(1))
        # is unavailable / rejected; structure is otherwise identical.
        out2d = build(single_buffer_consts=False)(*args)

    return out2d.reshape(B_pad, Np, Cout)[:B_, :N, :C]


# --------------------------------------------------------------------------
# Pure-JAX reference (mirrors the PyTorch forward, mask=None, eval mode).
# --------------------------------------------------------------------------
def window_attention_ref(x, params, window_size, num_heads):
    B_, N, C = x.shape
    H = num_heads
    hd = C // H
    scale = hd ** (-0.5)

    qkv = x @ params['qkv_w'].T + params['qkv_b']                # (B_, N, 3C)
    qkv = qkv.reshape(B_, N, 3, H, hd).transpose(2, 0, 3, 1, 4)  # (3, B_, H, N, hd)
    q, k, v = qkv[0], qkv[1], qkv[2]
    q = q * scale
    attn = q @ jnp.swapaxes(k, -2, -1)                           # (B_, H, N, N)

    rel_index = make_relative_position_index(window_size)
    rel_bias = params['rel_bias_table'][rel_index.reshape(-1)]
    rel_bias = rel_bias.reshape(N, N, H).transpose(2, 0, 1)      # (H, N, N)
    attn = attn + rel_bias[None]

    attn = jax.nn.softmax(attn, axis=-1)
    out = (attn @ v).transpose(0, 2, 1, 3).reshape(B_, N, C)
    return out @ params['proj_w'].T + params['proj_b']


# --------------------------------------------------------------------------
if __name__ == "__main__":
    def make_params(key, dim, window_size, num_heads):
        k1, k2, k3, k4, k5 = jax.random.split(key, 5)
        nbias = (2 * window_size[0] - 1) * (2 * window_size[1] - 1)
        return {
            'qkv_w': jax.random.normal(k1, (3 * dim, dim), jnp.float32) * 0.05,
            'qkv_b': jax.random.normal(k2, (3 * dim,), jnp.float32) * 0.05,
            'proj_w': jax.random.normal(k3, (dim, dim), jnp.float32) * 0.05,
            'proj_b': jax.random.normal(k4, (dim,), jnp.float32) * 0.05,
            'rel_bias_table': jax.random.normal(k5, (nbias, num_heads),
                                                jnp.float32) * 0.02,
        }

    key = jax.random.PRNGKey(0)
    kx1, kp1, kx2, kp2 = jax.random.split(key, 4)

    # --- config 1: 4x4 window (N=16), dim=32, 4 heads, 2 windows -----------
    dim, ws, H = 32, (4, 4), 4
    N = ws[0] * ws[1]
    B_ = 2
    x = jax.random.normal(kx1, (B_, N, dim), jnp.float32)
    params = make_params(kp1, dim, ws, H)
    ref = window_attention_ref(x, params, ws, H)

    prep_f32 = prepare_window_attention_params(params, ws, H,
                                               compute_dtype=jnp.float32)
    out_f32 = jax.block_until_ready(window_attention(x, prep_f32))
    assert out_f32.shape == (B_, N, dim)
    assert jnp.allclose(out_f32, ref, atol=1e-4, rtol=1e-4), "f32 mismatch (4x4)"

    prep_bf16 = prepare_window_attention_params(params, ws, H,
                                                compute_dtype=jnp.bfloat16)
    out_bf16 = jax.block_until_ready(window_attention(x, prep_bf16))
    assert out_bf16.shape == (B_, N, dim)
    assert jnp.allclose(out_bf16, ref, atol=3e-2, rtol=3e-2), "bf16 mismatch (4x4)"

    # --- config 2: canonical Swin 7x7 window (N=49 -> padded to 56) --------
    dim2, ws2, H2 = 32, (7, 7), 4
    N2 = ws2[0] * ws2[1]
    B2 = 3
    x2 = jax.random.normal(kx2, (B2, N2, dim2), jnp.float32)
    params2 = make_params(kp2, dim2, ws2, H2)
    ref2 = window_attention_ref(x2, params2, ws2, H2)

    prep2 = prepare_window_attention_params(params2, ws2, H2,
                                            compute_dtype=jnp.float32)
    out2 = jax.block_until_ready(window_attention(x2, prep2))
    assert out2.shape == (B2, N2, dim2)
    assert jnp.allclose(out2, ref2, atol=2e-4, rtol=2e-4), "f32 mismatch (7x7)"

    print("KERNEL_OK")
</pallas_src>

<mosaic_0001>
module attributes {stable_mosaic.version = 11 : i64} {
  func.func @_window_attn_kernel(%arg0: i32, %arg1: memref<16x128xf32, #tpu.memory_space<vmem>>, %arg2: memref<128x96xf32, #tpu.memory_space<vmem>>, %arg3: memref<1x96xf32, #tpu.memory_space<vmem>>, %arg4: memref<4x16x16xf32, #tpu.memory_space<vmem>>, %arg5: memref<32x128xf32, #tpu.memory_space<vmem>>, %arg6: memref<1x128xf32, #tpu.memory_space<vmem>>, %arg7: memref<16x128xf32, #tpu.memory_space<vmem>>) attributes {dimension_semantics = [#tpu.dimension_semantics<parallel>], iteration_bounds = array<i64: 2>, scalar_prefetch = 0 : i64, scratch_operands = 0 : i64, tpu.core_type = #tpu.core_type<tc>, window_params = [{transform_indices = @transform_0, window_bounds = array<i64: 16, 128>}, {pipeline_mode = #tpu.pipeline_mode<synchronous>, transform_indices = @transform_1, window_bounds = array<i64: 128, 96>}, {pipeline_mode = #tpu.pipeline_mode<synchronous>, transform_indices = @transform_2, window_bounds = array<i64: 1, 96>}, {pipeline_mode = #tpu.pipeline_mode<synchronous>, transform_indices = @transform_3, window_bounds = array<i64: 4, 16, 16>}, {pipeline_mode = #tpu.pipeline_mode<synchronous>, transform_indices = @transform_4, window_bounds = array<i64: 32, 128>}, {pipeline_mode = #tpu.pipeline_mode<synchronous>, transform_indices = @transform_5, window_bounds = array<i64: 1, 128>}, {transform_indices = @transform_6, window_bounds = array<i64: 16, 128>}]} {
    %c0 = arith.constant 0 : index
    %c0_0 = arith.constant 0 : index
    %0 = vector.load %arg1[%c0, %c0_0] : memref<16x128xf32, #tpu.memory_space<vmem>>, vector<16x128xf32>
    %c0_1 = arith.constant 0 : index
    %c0_2 = arith.constant 0 : index
    %1 = vector.load %arg2[%c0_1, %c0_2] : memref<128x96xf32, #tpu.memory_space<vmem>>, vector<128x96xf32>
    %cst = arith.constant dense<0.000000e+00> : vector<16x96xf32>
    %2 = tpu.matmul %0, %1, %cst {dimension_numbers = #tpu.dot_dimension_numbers<[1], [0], [0], [1], [0, 0, 1, 1], [], []>} : vector<16x128xf32>, vector<128x96xf32>, vector<16x96xf32> -> vector<16x96xf32>
    %c0_3 = arith.constant 0 : index
    %c0_4 = arith.constant 0 : index
    %3 = vector.load %arg3[%c0_3, %c0_4] : memref<1x96xf32, #tpu.memory_space<vmem>>, vector<1x96xf32>
    %4 = vector.broadcast %3 : vector<1x96xf32> to vector<16x96xf32>
    %5 = arith.addf %2, %4 : vector<16x96xf32>
    %c0_5 = arith.constant 0 : index
    %c0_6 = arith.constant 0 : index
    %c0_7 = arith.constant 0 : index
    %6 = vector.load %arg4[%c0_5, %c0_6, %c0_7] : memref<4x16x16xf32, #tpu.memory_space<vmem>>, vector<4x16x16xf32>
    %7 = vector.extract_strided_slice %5 {offsets = [0, 0], sizes = [16, 8], strides = [1, 1]} : vector<16x96xf32> to vector<16x8xf32>
    %8 = vector.extract_strided_slice %5 {offsets = [0, 32], sizes = [16, 8], strides = [1, 1]} : vector<16x96xf32> to vector<16x8xf32>
    %9 = vector.extract_strided_slice %5 {offsets = [0, 64], sizes = [16, 8], strides = [1, 1]} : vector<16x96xf32> to vector<16x8xf32>
    %10 = vector.shape_cast %7 : vector<16x8xf32> to vector<1x16x8xf32>
    %11 = vector.shape_cast %8 : vector<16x8xf32> to vector<1x16x8xf32>
    %12 = vector.shape_cast %9 : vector<16x8xf32> to vector<1x16x8xf32>
    "tpu.trace_start"() <{level = 10 : i32, message = "wnd,wmd->wnm"}> : () -> ()
    %cst_8 = arith.constant dense<0.000000e+00> : vector<1x16x16xf32>
    %13 = tpu.matmul %10, %11, %cst_8 {dimension_numbers = #tpu.dot_dimension_numbers<[2], [2], [1], [1], [0, 0, 0, 1, 1, 1], [0], [0]>} : vector<1x16x8xf32>, vector<1x16x8xf32>, vector<1x16x16xf32> -> vector<1x16x16xf32>
    "tpu.trace_stop"() : () -> ()
    %14 = vector.extract_strided_slice %6 {offsets = [0, 0, 0], sizes = [1, 16, 16], strides = [1, 1, 1]} : vector<4x16x16xf32> to vector<1x16x16xf32>
    %15 = vector.shape_cast %14 : vector<1x16x16xf32> to vector<16x16xf32>
    %16 = vector.shape_cast %15 : vector<16x16xf32> to vector<1x16x16xf32>
    %17 = arith.addf %13, %16 : vector<1x16x16xf32>
    %cst_9 = arith.constant dense<0xFF800000> : vector<1x16xf32>
    %18 = vector.multi_reduction <maximumf>, %17, %cst_9 [2] : vector<1x16x16xf32> to vector<1x16xf32>
    %19 = vector.shape_cast %18 : vector<1x16xf32> to vector<1x16x1xf32>
    %20 = vector.broadcast %19 : vector<1x16x1xf32> to vector<1x16x16xf32>
    %21 = arith.subf %17, %20 : vector<1x16x16xf32>
    %22 = math.exp %21 : vector<1x16x16xf32>
    %cst_10 = arith.constant dense<0.000000e+00> : vector<1x16xf32>
    %23 = vector.multi_reduction <add>, %22, %cst_10 [2] : vector<1x16x16xf32> to vector<1x16xf32>
    %24 = vector.shape_cast %23 : vector<1x16xf32> to vector<1x16x1xf32>
    %25 = tpu.reciprocal %24 : vector<1x16x1xf32> -> vector<1x16x1xf32>
    %26 = vector.broadcast %25 : vector<1x16x1xf32> to vector<1x16x16xf32>
    %27 = arith.mulf %22, %26 : vector<1x16x16xf32>
    "tpu.trace_start"() <{level = 10 : i32, message = "wnm,wmd->wnd"}> : () -> ()
    %cst_11 = arith.constant dense<0.000000e+00> : vector<1x16x8xf32>
    %28 = tpu.matmul %27, %12, %cst_11 {dimension_numbers = #tpu.dot_dimension_numbers<[2], [1], [1], [2], [0, 0, 0, 1, 1, 2], [0], [0]>} : vector<1x16x16xf32>, vector<1x16x8xf32>, vector<1x16x8xf32> -> vector<1x16x8xf32>
    "tpu.trace_stop"() : () -> ()
    %29 = vector.shape_cast %28 : vector<1x16x8xf32> to vector<16x8xf32>
    %30 = vector.extract_strided_slice %5 {offsets = [0, 8], sizes = [16, 8], strides = [1, 1]} : vector<16x96xf32> to vector<16x8xf32>
    %31 = vector.extract_strided_slice %5 {offsets = [0, 40], sizes = [16, 8], strides = [1, 1]} : vector<16x96xf32> to vector<16x8xf32>
    %32 = vector.extract_strided_slice %5 {offsets = [0, 72], sizes = [16, 8], strides = [1, 1]} : vector<16x96xf32> to vector<16x8xf32>
    %33 = vector.shape_cast %30 : vector<16x8xf32> to vector<1x16x8xf32>
    %34 = vector.shape_cast %31 : vector<16x8xf32> to vector<1x16x8xf32>
    %35 = vector.shape_cast %32 : vector<16x8xf32> to vector<1x16x8xf32>
    "tpu.trace_start"() <{level = 10 : i32, message = "wnd,wmd->wnm"}> : () -> ()
    %cst_12 = arith.constant dense<0.000000e+00> : vector<1x16x16xf32>
    %36 = tpu.matmul %33, %34, %cst_12 {dimension_numbers = #tpu.dot_dimension_numbers<[2], [2], [1], [1], [0, 0, 0, 1, 1, 1], [0], [0]>} : vector<1x16x8xf32>, vector<1x16x8xf32>, vector<1x16x16xf32> -> vector<1x16x16xf32>
    "tpu.trace_stop"() : () -> ()
    %37 = vector.extract_strided_slice %6 {offsets = [1, 0, 0], sizes = [1, 16, 16], strides = [1, 1, 1]} : vector<4x16x16xf32> to vector<1x16x16xf32>
    %38 = vector.shape_cast %37 : vector<1x16x16xf32> to vector<16x16xf32>
    %39 = vector.shape_cast %38 : vector<16x16xf32> to vector<1x16x16xf32>
    %40 = arith.addf %36, %39 : vector<1x16x16xf32>
    %cst_13 = arith.constant dense<0xFF800000> : vector<1x16xf32>
    %41 = vector.multi_reduction <maximumf>, %40, %cst_13 [2] : vector<1x16x16xf32> to vector<1x16xf32>
    %42 = vector.shape_cast %41 : vector<1x16xf32> to vector<1x16x1xf32>
    %43 = vector.broadcast %42 : vector<1x16x1xf32> to vector<1x16x16xf32>
    %44 = arith.subf %40, %43 : vector<1x16x16xf32>
    %45 = math.exp %44 : vector<1x16x16xf32>
    %cst_14 = arith.constant dense<0.000000e+00> : vector<1x16xf32>
    %46 = vector.multi_reduction <add>, %45, %cst_14 [2] : vector<1x16x16xf32> to vector<1x16xf32>
    %47 = vector.shape_cast %46 : vector<1x16xf32> to vector<1x16x1xf32>
    %48 = tpu.reciprocal %47 : vector<1x16x1xf32> -> vector<1x16x1xf32>
    %49 = vector.broadcast %48 : vector<1x16x1xf32> to vector<1x16x16xf32>
    %50 = arith.mulf %45, %49 : vector<1x16x16xf32>
    "tpu.trace_start"() <{level = 10 : i32, message = "wnm,wmd->wnd"}> : () -> ()
    %cst_15 = arith.constant dense<0.000000e+00> : vector<1x16x8xf32>
    %51 = tpu.matmul %50, %35, %cst_15 {dimension_numbers = #tpu.dot_dimension_numbers<[2], [1], [1], [2], [0, 0, 0, 1, 1, 2], [0], [0]>} : vector<1x16x16xf32>, vector<1x16x8xf32>, vector<1x16x8xf32> -> vector<1x16x8xf32>
    "tpu.trace_stop"() : () -> ()
    %52 = vector.shape_cast %51 : vector<1x16x8xf32> to vector<16x8xf32>
    %53 = vector.extract_strided_slice %5 {offsets = [0, 16], sizes = [16, 8], strides = [1, 1]} : vector<16x96xf32> to vector<16x8xf32>
    %54 = vector.extract_strided_slice %5 {offsets = [0, 48], sizes = [16, 8], strides = [1, 1]} : vector<16x96xf32> to vector<16x8xf32>
    %55 = vector.extract_strided_slice %5 {offsets = [0, 80], sizes = [16, 8], strides = [1, 1]} : vector<16x96xf32> to vector<16x8xf32>
    %56 = vector.shape_cast %53 : vector<16x8xf32> to vector<1x16x8xf32>
    %57 = vector.shape_cast %54 : vector<16x8xf32> to vector<1x16x8xf32>
    %58 = vector.shape_cast %55 : vector<16x8xf32> to vector<1x16x8xf32>
    "tpu.trace_start"() <{level = 10 : i32, message = "wnd,wmd->wnm"}> : () -> ()
    %cst_16 = arith.constant dense<0.000000e+00> : vector<1x16x16xf32>
    %59 = tpu.matmul %56, %57, %cst_16 {dimension_numbers = #tpu.dot_dimension_numbers<[2], [2], [1], [1], [0, 0, 0, 1, 1, 1], [0], [0]>} : vector<1x16x8xf32>, vector<1x16x8xf32>, vector<1x16x16xf32> -> vector<1x16x16xf32>
    "tpu.trace_stop"() : () -> ()
    %60 = vector.extract_strided_slice %6 {offsets = [2, 0, 0], sizes = [1, 16, 16], strides = [1, 1, 1]} : vector<4x16x16xf32> to vector<1x16x16xf32>
    %61 = vector.shape_cast %60 : vector<1x16x16xf32> to vector<16x16xf32>
    %62 = vector.shape_cast %61 : vector<16x16xf32> to vector<1x16x16xf32>
    %63 = arith.addf %59, %62 : vector<1x16x16xf32>
    %cst_17 = arith.constant dense<0xFF800000> : vector<1x16xf32>
    %64 = vector.multi_reduction <maximumf>, %63, %cst_17 [2] : vector<1x16x16xf32> to vector<1x16xf32>
    %65 = vector.shape_cast %64 : vector<1x16xf32> to vector<1x16x1xf32>
    %66 = vector.broadcast %65 : vector<1x16x1xf32> to vector<1x16x16xf32>
    %67 = arith.subf %63, %66 : vector<1x16x16xf32>
    %68 = math.exp %67 : vector<1x16x16xf32>
    %cst_18 = arith.constant dense<0.000000e+00> : vector<1x16xf32>
    %69 = vector.multi_reduction <add>, %68, %cst_18 [2] : vector<1x16x16xf32> to vector<1x16xf32>
    %70 = vector.shape_cast %69 : vector<1x16xf32> to vector<1x16x1xf32>
    %71 = tpu.reciprocal %70 : vector<1x16x1xf32> -> vector<1x16x1xf32>
    %72 = vector.broadcast %71 : vector<1x16x1xf32> to vector<1x16x16xf32>
    %73 = arith.mulf %68, %72 : vector<1x16x16xf32>
    "tpu.trace_start"() <{level = 10 : i32, message = "wnm,wmd->wnd"}> : () -> ()
    %cst_19 = arith.constant dense<0.000000e+00> : vector<1x16x8xf32>
    %74 = tpu.matmul %73, %58, %cst_19 {dimension_numbers = #tpu.dot_dimension_numbers<[2], [1], [1], [2], [0, 0, 0, 1, 1, 2], [0], [0]>} : vector<1x16x16xf32>, vector<1x16x8xf32>, vector<1x16x8xf32> -> vector<1x16x8xf32>
    "tpu.trace_stop"() : () -> ()
    %75 = vector.shape_cast %74 : vector<1x16x8xf32> to vector<16x8xf32>
    %76 = vector.extract_strided_slice %5 {offsets = [0, 24], sizes = [16, 8], strides = [1, 1]} : vector<16x96xf32> to vector<16x8xf32>
    %77 = vector.extract_strided_slice %5 {offsets = [0, 56], sizes = [16, 8], strides = [1, 1]} : vector<16x96xf32> to vector<16x8xf32>
    %78 = vector.extract_strided_slice %5 {offsets = [0, 88], sizes = [16, 8], strides = [1, 1]} : vector<16x96xf32> to vector<16x8xf32>
    %79 = vector.shape_cast %76 : vector<16x8xf32> to vector<1x16x8xf32>
    %80 = vector.shape_cast %77 : vector<16x8xf32> to vector<1x16x8xf32>
    %81 = vector.shape_cast %78 : vector<16x8xf32> to vector<1x16x8xf32>
    "tpu.trace_start"() <{level = 10 : i32, message = "wnd,wmd->wnm"}> : () -> ()
    %cst_20 = arith.constant dense<0.000000e+00> : vector<1x16x16xf32>
    %82 = tpu.matmul %79, %80, %cst_20 {dimension_numbers = #tpu.dot_dimension_numbers<[2], [2], [1], [1], [0, 0, 0, 1, 1, 1], [0], [0]>} : vector<1x16x8xf32>, vector<1x16x8xf32>, vector<1x16x16xf32> -> vector<1x16x16xf32>
    "tpu.trace_stop"() : () -> ()
    %83 = vector.extract_strided_slice %6 {offsets = [3, 0, 0], sizes = [1, 16, 16], strides = [1, 1, 1]} : vector<4x16x16xf32> to vector<1x16x16xf32>
    %84 = vector.shape_cast %83 : vector<1x16x16xf32> to vector<16x16xf32>
    %85 = vector.shape_cast %84 : vector<16x16xf32> to vector<1x16x16xf32>
    %86 = arith.addf %82, %85 : vector<1x16x16xf32>
    %cst_21 = arith.constant dense<0xFF800000> : vector<1x16xf32>
    %87 = vector.multi_reduction <maximumf>, %86, %cst_21 [2] : vector<1x16x16xf32> to vector<1x16xf32>
    %88 = vector.shape_cast %87 : vector<1x16xf32> to vector<1x16x1xf32>
    %89 = vector.broadcast %88 : vector<1x16x1xf32> to vector<1x16x16xf32>
    %90 = arith.subf %86, %89 : vector<1x16x16xf32>
    %91 = math.exp %90 : vector<1x16x16xf32>
    %cst_22 = arith.constant dense<0.000000e+00> : vector<1x16xf32>
    %92 = vector.multi_reduction <add>, %91, %cst_22 [2] : vector<1x16x16xf32> to vector<1x16xf32>
    %93 = vector.shape_cast %92 : vector<1x16xf32> to vector<1x16x1xf32>
    %94 = tpu.reciprocal %93 : vector<1x16x1xf32> -> vector<1x16x1xf32>
    %95 = vector.broadcast %94 : vector<1x16x1xf32> to vector<1x16x16xf32>
    %96 = arith.mulf %91, %95 : vector<1x16x16xf32>
    "tpu.trace_start"() <{level = 10 : i32, message = "wnm,wmd->wnd"}> : () -> ()
    %cst_23 = arith.constant dense<0.000000e+00> : vector<1x16x8xf32>
    %97 = tpu.matmul %96, %81, %cst_23 {dimension_numbers = #tpu.dot_dimension_numbers<[2], [1], [1], [2], [0, 0, 0, 1, 1, 2], [0], [0]>} : vector<1x16x16xf32>, vector<1x16x8xf32>, vector<1x16x8xf32> -> vector<1x16x8xf32>
    "tpu.trace_stop"() : () -> ()
    %98 = vector.shape_cast %97 : vector<1x16x8xf32> to vector<16x8xf32>
    %99 = tpu.concatenate %29, %52, %75, %98 in 1 : vector<16x8xf32>, vector<16x8xf32>, vector<16x8xf32>, vector<16x8xf32> -> vector<16x32xf32>
    %c0_24 = arith.constant 0 : index
    %c0_25 = arith.constant 0 : index
    %100 = vector.load %arg5[%c0_24, %c0_25] : memref<32x128xf32, #tpu.memory_space<vmem>>, vector<32x128xf32>
    %cst_26 = arith.constant dense<0.000000e+00> : vector<16x128xf32>
    %101 = tpu.matmul %99, %100, %cst_26 {dimension_numbers = #tpu.dot_dimension_numbers<[1], [0], [0], [1], [0, 0, 1, 1], [], []>} : vector<16x32xf32>, vector<32x128xf32>, vector<16x128xf32> -> vector<16x128xf32>
    %c0_27 = arith.constant 0 : index
    %c0_28 = arith.constant 0 : index
    %102 = vector.load %arg6[%c0_27, %c0_28] : memref<1x128xf32, #tpu.memory_space<vmem>>, vector<1x128xf32>
    %103 = vector.broadcast %102 : vector<1x128xf32> to vector<16x128xf32>
    %104 = arith.addf %101, %103 : vector<16x128xf32>
    %c0_29 = arith.constant 0 : index
    %c0_30 = arith.constant 0 : index
    %105 = vector.load %arg7[%c0_29, %c0_30] : memref<16x128xf32, #tpu.memory_space<vmem>>, vector<16x128xf32>
    tpu.vector_store %arg7[%c0_29, %c0_30], %104 {strides = array<i32>} : memref<16x128xf32, #tpu.memory_space<vmem>>, vector<16x128xf32>,
    return
  }
  func.func @transform_0(%arg0: i32) -> (i32, i32) {
    %c0_i32 = arith.constant 0 : i32
    %c0_i32_0 = arith.constant 0 : i32
    return %arg0, %c0_i32 : i32, i32
  }
  func.func @transform_1(%arg0: i32) -> (i32, i32) {
    %c0_i32 = arith.constant 0 : i32
    %c0_i32_0 = arith.constant 0 : i32
    %c0_i32_1 = arith.constant 0 : i32
    return %c0_i32, %c0_i32_0 : i32, i32
  }
  func.func @transform_2(%arg0: i32) -> (i32, i32) {
    %c0_i32 = arith.constant 0 : i32
    %c0_i32_0 = arith.constant 0 : i32
    %c0_i32_1 = arith.constant 0 : i32
    return %c0_i32, %c0_i32_0 : i32, i32
  }
  func.func @transform_3(%arg0: i32) -> (i32, i32, i32) {
    %c0_i32 = arith.constant 0 : i32
    %c0_i32_0 = arith.constant 0 : i32
    %c0_i32_1 = arith.constant 0 : i32
    %c0_i32_2 = arith.constant 0 : i32
    return %c0_i32, %c0_i32_0, %c0_i32_1 : i32, i32, i32
  }
  func.func @transform_4(%arg0: i32) -> (i32, i32) {
    %c0_i32 = arith.constant 0 : i32
    %c0_i32_0 = arith.constant 0 : i32
    %c0_i32_1 = arith.constant 0 : i32
    return %c0_i32, %c0_i32_0 : i32, i32
  }
  func.func @transform_5(%arg0: i32) -> (i32, i32) {
    %c0_i32 = arith.constant 0 : i32
    %c0_i32_0 = arith.constant 0 : i32
    %c0_i32_1 = arith.constant 0 : i32
    return %c0_i32, %c0_i32_0 : i32, i32
  }
  func.func @transform_6(%arg0: i32) -> (i32, i32) {
    %c0_i32 = arith.constant 0 : i32
    %c0_i32_0 = arith.constant 0 : i32
    return %arg0, %c0_i32 : i32, i32
  }
}

module attributes {stable_mosaic.version = 11 : i64} {
  func.func @_window_attn_kernel(%arg0: i32, %arg1: memref<16x128xf32, #tpu.memory_space<vmem>>, %arg2: memref<128x96xf32, #tpu.memory_space<vmem>>, %arg3: memref<1x96xf32, #tpu.memory_space<vmem>>, %arg4: memref<4x16x16xf32, #tpu.memory_space<vmem>>, %arg5: memref<32x128xf32, #tpu.memory_space<vmem>>, %arg6: memref<1x128xf32, #tpu.memory_space<vmem>>, %arg7: memref<16x128xf32, #tpu.memory_space<vmem>>) attributes {dimension_semantics = [#tpu.dimension_semantics<parallel>], iteration_bounds = array<i64: 2>, scalar_prefetch = 0 : i64, scratch_operands = 0 : i64, tpu.core_type = #tpu.core_type<tc>, window_params = [{transform_indices = @transform_0, window_bounds = array<i64: 16, 128>}, {pipeline_mode = #tpu.pipeline_mode<synchronous>, transform_indices = @transform_1, window_bounds = array<i64: 128, 96>}, {pipeline_mode = #tpu.pipeline_mode<synchronous>, transform_indices = @transform_2, window_bounds = array<i64: 1, 96>}, {pipeline_mode = #tpu.pipeline_mode<synchronous>, transform_indices = @transform_3, window_bounds = array<i64: 4, 16, 16>}, {pipeline_mode = #tpu.pipeline_mode<synchronous>, transform_indices = @transform_4, window_bounds = array<i64: 32, 128>}, {pipeline_mode = #tpu.pipeline_mode<synchronous>, transform_indices = @transform_5, window_bounds = array<i64: 1, 128>}, {transform_indices = @transform_6, window_bounds = array<i64: 16, 128>}]} {
    %c0 = arith.constant 0 : index
    %c0_0 = arith.constant 0 : index
    %0 = vector.load %arg1[%c0, %c0_0] : memref<16x128xf32, #tpu.memory_space<vmem>>, vector<16x128xf32>
    %c0_1 = arith.constant 0 : index
    %c0_2 = arith.constant 0 : index
    %1 = vector.load %arg2[%c0_1, %c0_2] : memref<128x96xf32, #tpu.memory_space<vmem>>, vector<128x96xf32>
    %cst = arith.constant dense<0.000000e+00> : vector<16x96xf32>
    %2 = tpu.matmul %0, %1, %cst {dimension_numbers = #tpu.dot_dimension_numbers<[1], [0], [0], [1], [0, 0, 1, 1], [], []>} : vector<16x128xf32>, vector<128x96xf32>, vector<16x96xf32> -> vector<16x96xf32>
    %c0_3 = arith.constant 0 : index
    %c0_4 = arith.constant 0 : index
    %3 = vector.load %arg3[%c0_3, %c0_4] : memref<1x96xf32, #tpu.memory_space<vmem>>, vector<1x96xf32>
    %4 = vector.broadcast %3 : vector<1x96xf32> to vector<16x96xf32>
    %5 = arith.addf %2, %4 : vector<16x96xf32>
    %c0_5 = arith.constant 0 : index
    %c0_6 = arith.constant 0 : index
    %c0_7 = arith.constant 0 : index
    %6 = vector.load %arg4[%c0_5, %c0_6, %c0_7] : memref<4x16x16xf32, #tpu.memory_space<vmem>>, vector<4x16x16xf32>
    %7 = vector.extract_strided_slice %5 {offsets = [0, 0], sizes = [16, 8], strides = [1, 1]} : vector<16x96xf32> to vector<16x8xf32>
    %8 = vector.extract_strided_slice %5 {offsets = [0, 32], sizes = [16, 8], strides = [1, 1]} : vector<16x96xf32> to vector<16x8xf32>
    %9 = vector.extract_strided_slice %5 {offsets = [0, 64], sizes = [16, 8], strides = [1, 1]} : vector<16x96xf32> to vector<16x8xf32>
    %10 = vector.shape_cast %7 : vector<16x8xf32> to vector<1x16x8xf32>
    %11 = vector.shape_cast %8 : vector<16x8xf32> to vector<1x16x8xf32>
    %12 = vector.shape_cast %9 : vector<16x8xf32> to vector<1x16x8xf32>
    "tpu.trace_start"() <{level = 10 : i32, message = "wnd,wmd->wnm"}> : () -> ()
    %cst_8 = arith.constant dense<0.000000e+00> : vector<1x16x16xf32>
    %13 = tpu.matmul %10, %11, %cst_8 {dimension_numbers = #tpu.dot_dimension_numbers<[2], [2], [1], [1], [0, 0, 0, 1, 1, 1], [0], [0]>} : vector<1x16x8xf32>, vector<1x16x8xf32>, vector<1x16x16xf32> -> vector<1x16x16xf32>
    "tpu.trace_stop"() : () -> ()
    %14 = vector.extract_strided_slice %6 {offsets = [0, 0, 0], sizes = [1, 16, 16], strides = [1, 1, 1]} : vector<4x16x16xf32> to vector<1x16x16xf32>
    %15 = vector.shape_cast %14 : vector<1x16x16xf32> to vector<16x16xf32>
    %16 = vector.shape_cast %15 : vector<16x16xf32> to vector<1x16x16xf32>
    %17 = arith.addf %13, %16 : vector<1x16x16xf32>
    %cst_9 = arith.constant dense<0xFF800000> : vector<1x16xf32>
    %18 = vector.multi_reduction <maximumf>, %17, %cst_9 [2] : vector<1x16x16xf32> to vector<1x16xf32>
    %19 = vector.shape_cast %18 : vector<1x16xf32> to vector<1x16x1xf32>
    %20 = vector.broadcast %19 : vector<1x16x1xf32> to vector<1x16x16xf32>
    %21 = arith.subf %17, %20 : vector<1x16x16xf32>
    %22 = math.exp %21 : vector<1x16x16xf32>
    %cst_10 = arith.constant dense<0.000000e+00> : vector<1x16xf32>
    %23 = vector.multi_reduction <add>, %22, %cst_10 [2] : vector<1x16x16xf32> to vector<1x16xf32>
    %24 = vector.shape_cast %23 : vector<1x16xf32> to vector<1x16x1xf32>
    %25 = tpu.reciprocal %24 : vector<1x16x1xf32> -> vector<1x16x1xf32>
    %26 = vector.broadcast %25 : vector<1x16x1xf32> to vector<1x16x16xf32>
    %27 = arith.mulf %22, %26 : vector<1x16x16xf32>
    "tpu.trace_start"() <{level = 10 : i32, message = "wnm,wmd->wnd"}> : () -> ()
    %cst_11 = arith.constant dense<0.000000e+00> : vector<1x16x8xf32>
    %28 = tpu.matmul %27, %12, %cst_11 {dimension_numbers = #tpu.dot_dimension_numbers<[2], [1], [1], [2], [0, 0, 0, 1, 1, 2], [0], [0]>} : vector<1x16x16xf32>, vector<1x16x8xf32>, vector<1x16x8xf32> -> vector<1x16x8xf32>
    "tpu.trace_stop"() : () -> ()
    %29 = vector.shape_cast %28 : vector<1x16x8xf32> to vector<16x8xf32>
    %30 = vector.extract_strided_slice %5 {offsets = [0, 8], sizes = [16, 8], strides = [1, 1]} : vector<16x96xf32> to vector<16x8xf32>
    %31 = vector.extract_strided_slice %5 {offsets = [0, 40], sizes = [16, 8], strides = [1, 1]} : vector<16x96xf32> to vector<16x8xf32>
    %32 = vector.extract_strided_slice %5 {offsets = [0, 72], sizes = [16, 8], strides = [1, 1]} : vector<16x96xf32> to vector<16x8xf32>
    %33 = vector.shape_cast %30 : vector<16x8xf32> to vector<1x16x8xf32>
    %34 = vector.shape_cast %31 : vector<16x8xf32> to vector<1x16x8xf32>
    %35 = vector.shape_cast %32 : vector<16x8xf32> to vector<1x16x8xf32>
    "tpu.trace_start"() <{level = 10 : i32, message = "wnd,wmd->wnm"}> : () -> ()
    %cst_12 = arith.constant dense<0.000000e+00> : vector<1x16x16xf32>
    %36 = tpu.matmul %33, %34, %cst_12 {dimension_numbers = #tpu.dot_dimension_numbers<[2], [2], [1], [1], [0, 0, 0, 1, 1, 1], [0], [0]>} : vector<1x16x8xf32>, vector<1x16x8xf32>, vector<1x16x16xf32> -> vector<1x16x16xf32>
    "tpu.trace_stop"() : () -> ()
    %37 = vector.extract_strided_slice %6 {offsets = [1, 0, 0], sizes = [1, 16, 16], strides = [1, 1, 1]} : vector<4x16x16xf32> to vector<1x16x16xf32>
    %38 = vector.shape_cast %37 : vector<1x16x16xf32> to vector<16x16xf32>
    %39 = vector.shape_cast %38 : vector<16x16xf32> to vector<1x16x16xf32>
    %40 = arith.addf %36, %39 : vector<1x16x16xf32>
    %cst_13 = arith.constant dense<0xFF800000> : vector<1x16xf32>
    %41 = vector.multi_reduction <maximumf>, %40, %cst_13 [2] : vector<1x16x16xf32> to vector<1x16xf32>
    %42 = vector.shape_cast %41 : vector<1x16xf32> to vector<1x16x1xf32>
    %43 = vector.broadcast %42 : vector<1x16x1xf32> to vector<1x16x16xf32>
    %44 = arith.subf %40, %43 : vector<1x16x16xf32>
    %45 = math.exp %44 : vector<1x16x16xf32>
    %cst_14 = arith.constant dense<0.000000e+00> : vector<1x16xf32>
    %46 = vector.multi_reduction <add>, %45, %cst_14 [2] : vector<1x16x16xf32> to vector<1x16xf32>
    %47 = vector.shape_cast %46 : vector<1x16xf32> to vector<1x16x1xf32>
    %48 = tpu.reciprocal %47 : vector<1x16x1xf32> -> vector<1x16x1xf32>
    %49 = vector.broadcast %48 : vector<1x16x1xf32> to vector<1x16x16xf32>
    %50 = arith.mulf %45, %49 : vector<1x16x16xf32>
    "tpu.trace_start"() <{level = 10 : i32, message = "wnm,wmd->wnd"}> : () -> ()
    %cst_15 = arith.constant dense<0.000000e+00> : vector<1x16x8xf32>
    %51 = tpu.matmul %50, %35, %cst_15 {dimension_numbers = #tpu.dot_dimension_numbers<[2], [1], [1], [2], [0, 0, 0, 1, 1, 2], [0], [0]>} : vector<1x16x16xf32>, vector<1x16x8xf32>, vector<1x16x8xf32> -> vector<1x16x8xf32>
    "tpu.trace_stop"() : () -> ()
    %52 = vector.shape_cast %51 : vector<1x16x8xf32> to vector<16x8xf32>
    %53 = vector.extract_strided_slice %5 {offsets = [0, 16], sizes = [16, 8], strides = [1, 1]} : vector<16x96xf32> to vector<16x8xf32>
    %54 = vector.extract_strided_slice %5 {offsets = [0, 48], sizes = [16, 8], strides = [1, 1]} : vector<16x96xf32> to vector<16x8xf32>
    %55 = vector.extract_strided_slice %5 {offsets = [0, 80], sizes = [16, 8], strides = [1, 1]} : vector<16x96xf32> to vector<16x8xf32>
    %56 = vector.shape_cast %53 : vector<16x8xf32> to vector<1x16x8xf32>
    %57 = vector.shape_cast %54 : vector<16x8xf32> to vector<1x16x8xf32>
    %58 = vector.shape_cast %55 : vector<16x8xf32> to vector<1x16x8xf32>
    "tpu.trace_start"() <{level = 10 : i32, message = "wnd,wmd->wnm"}> : () -> ()
    %cst_16 = arith.constant dense<0.000000e+00> : vector<1x16x16xf32>
    %59 = tpu.matmul %56, %57, %cst_16 {dimension_numbers = #tpu.dot_dimension_numbers<[2], [2], [1], [1], [0, 0, 0, 1, 1, 1], [0], [0]>} : vector<1x16x8xf32>, vector<1x16x8xf32>, vector<1x16x16xf32> -> vector<1x16x16xf32>
    "tpu.trace_stop"() : () -> ()
    %60 = vector.extract_strided_slice %6 {offsets = [2, 0, 0], sizes = [1, 16, 16], strides = [1, 1, 1]} : vector<4x16x16xf32> to vector<1x16x16xf32>
    %61 = vector.shape_cast %60 : vector<1x16x16xf32> to vector<16x16xf32>
    %62 = vector.shape_cast %61 : vector<16x16xf32> to vector<1x16x16xf32>
    %63 = arith.addf %59, %62 : vector<1x16x16xf32>
    %cst_17 = arith.constant dense<0xFF800000> : vector<1x16xf32>
    %64 = vector.multi_reduction <maximumf>, %63, %cst_17 [2] : vector<1x16x16xf32> to vector<1x16xf32>
    %65 = vector.shape_cast %64 : vector<1x16xf32> to vector<1x16x1xf32>
    %66 = vector.broadcast %65 : vector<1x16x1xf32> to vector<1x16x16xf32>
    %67 = arith.subf %63, %66 : vector<1x16x16xf32>
    %68 = math.exp %67 : vector<1x16x16xf32>
    %cst_18 = arith.constant dense<0.000000e+00> : vector<1x16xf32>
    %69 = vector.multi_reduction <add>, %68, %cst_18 [2] : vector<1x16x16xf32> to vector<1x16xf32>
    %70 = vector.shape_cast %69 : vector<1x16xf32> to vector<1x16x1xf32>
    %71 = tpu.reciprocal %70 : vector<1x16x1xf32> -> vector<1x16x1xf32>
    %72 = vector.broadcast %71 : vector<1x16x1xf32> to vector<1x16x16xf32>
    %73 = arith.mulf %68, %72 : vector<1x16x16xf32>
    "tpu.trace_start"() <{level = 10 : i32, message = "wnm,wmd->wnd"}> : () -> ()
    %cst_19 = arith.constant dense<0.000000e+00> : vector<1x16x8xf32>
    %74 = tpu.matmul %73, %58, %cst_19 {dimension_numbers = #tpu.dot_dimension_numbers<[2], [1], [1], [2], [0, 0, 0, 1, 1, 2], [0], [0]>} : vector<1x16x16xf32>, vector<1x16x8xf32>, vector<1x16x8xf32> -> vector<1x16x8xf32>
    "tpu.trace_stop"() : () -> ()
    %75 = vector.shape_cast %74 : vector<1x16x8xf32> to vector<16x8xf32>
    %76 = vector.extract_strided_slice %5 {offsets = [0, 24], sizes = [16, 8], strides = [1, 1]} : vector<16x96xf32> to vector<16x8xf32>
    %77 = vector.extract_strided_slice %5 {offsets = [0, 56], sizes = [16, 8], strides = [1, 1]} : vector<16x96xf32> to vector<16x8xf32>
    %78 = vector.extract_strided_slice %5 {offsets = [0, 88], sizes = [16, 8], strides = [1, 1]} : vector<16x96xf32> to vector<16x8xf32>
    %79 = vector.shape_cast %76 : vector<16x8xf32> to vector<1x16x8xf32>
    %80 = vector.shape_cast %77 : vector<16x8xf32> to vector<1x16x8xf32>
    %81 = vector.shape_cast %78 : vector<16x8xf32> to vector<1x16x8xf32>
    "tpu.trace_start"() <{level = 10 : i32, message = "wnd,wmd->wnm"}> : () -> ()
    %cst_20 = arith.constant dense<0.000000e+00> : vector<1x16x16xf32>
    %82 = tpu.matmul %79, %80, %cst_20 {dimension_numbers = #tpu.dot_dimension_numbers<[2], [2], [1], [1], [0, 0, 0, 1, 1, 1], [0], [0]>} : vector<1x16x8xf32>, vector<1x16x8xf32>, vector<1x16x16xf32> -> vector<1x16x16xf32>
    "tpu.trace_stop"() : () -> ()
    %83 = vector.extract_strided_slice %6 {offsets = [3, 0, 0], sizes = [1, 16, 16], strides = [1, 1, 1]} : vector<4x16x16xf32> to vector<1x16x16xf32>
    %84 = vector.shape_cast %83 : vector<1x16x16xf32> to vector<16x16xf32>
    %85 = vector.shape_cast %84 : vector<16x16xf32> to vector<1x16x16xf32>
    %86 = arith.addf %82, %85 : vector<1x16x16xf32>
    %cst_21 = arith.constant dense<0xFF800000> : vector<1x16xf32>
    %87 = vector.multi_reduction <maximumf>, %86, %cst_21 [2] : vector<1x16x16xf32> to vector<1x16xf32>
    %88 = vector.shape_cast %87 : vector<1x16xf32> to vector<1x16x1xf32>
    %89 = vector.broadcast %88 : vector<1x16x1xf32> to vector<1x16x16xf32>
    %90 = arith.subf %86, %89 : vector<1x16x16xf32>
    %91 = math.exp %90 : vector<1x16x16xf32>
    %cst_22 = arith.constant dense<0.000000e+00> : vector<1x16xf32>
    %92 = vector.multi_reduction <add>, %91, %cst_22 [2] : vector<1x16x16xf32> to vector<1x16xf32>
    %93 = vector.shape_cast %92 : vector<1x16xf32> to vector<1x16x1xf32>
    %94 = tpu.reciprocal %93 : vector<1x16x1xf32> -> vector<1x16x1xf32>
    %95 = vector.broadcast %94 : vector<1x16x1xf32> to vector<1x16x16xf32>
    %96 = arith.mulf %91, %95 : vector<1x16x16xf32>
    "tpu.trace_start"() <{level = 10 : i32, message = "wnm,wmd->wnd"}> : () -> ()
    %cst_23 = arith.constant dense<0.000000e+00> : vector<1x16x8xf32>
    %97 = tpu.matmul %96, %81, %cst_23 {dimension_numbers = #tpu.dot_dimension_numbers<[2], [1], [1], [2], [0, 0, 0, 1, 1, 2], [0], [0]>} : vector<1x16x16xf32>, vector<1x16x8xf32>, vector<1x16x8xf32> -> vector<1x16x8xf32>
    "tpu.trace_stop"() : () -> ()
    %98 = vector.shape_cast %97 : vector<1x16x8xf32> to vector<16x8xf32>
    %99 = tpu.concatenate %29, %52, %75, %98 in 1 : vector<16x8xf32>, vector<16x8xf32>, vector<16x8xf32>, vector<16x8xf32> -> vector<16x32xf32>
    %c0_24 = arith.constant 0 : index
    %c0_25 = arith.constant 0 : index
    %100 = vector.load %arg5[%c0_24, %c0_25] : memref<32x128xf32, #tpu.memory_space<vmem>>, vector<32x128xf32>
    %cst_26 = arith.constant dense<0.000000e+00> : vector<16x128xf32>
    %101 = tpu.matmul %99, %100, %cst_26 {dimension_numbers = #tpu.dot_dimension_numbers<[1], [0], [0], [1], [0, 0, 1, 1], [], []>} : vector<16x32xf32>, vector<32x128xf32>, vector<16x128xf32> -> vector<16x128xf32>
    %c0_27 = arith.constant 0 : index
    %c0_28 = arith.constant 0 : index
    %102 = vector.load %arg6[%c0_27, %c0_28] : memref<1x128xf32, #tpu.memory_space<vmem>>, vector<1x128xf32>
    %103 = vector.broadcast %102 : vector<1x128xf32> to vector<16x128xf32>
    %104 = arith.addf %101, %103 : vector<16x128xf32>
    %c0_29 = arith.constant 0 : index
    %c0_30 = arith.constant 0 : index
    %105 = vector.load %arg7[%c0_29, %c0_30] : memref<16x128xf32, #tpu.memory_space<vmem>>, vector<16x128xf32>
    tpu.vector_store %arg7[%c0_29, %c0_30], %104 {strides = array<i32>} : memref<16x128xf32, #tpu.memory_space<vmem>>, vector<16x128xf32>,
    return
  }
  func.func @transform_0(%arg0: i32) -> (i32, i32) {
    %c0_i32 = arith.constant 0 : i32
    %c0_i32_0 = arith.constant 0 : i32
    return %arg0, %c0_i32 : i32, i32
  }
  func.func @transform_1(%arg0: i32) -> (i32, i32) {
    %c0_i32 = arith.constant 0 : i32
    %c0_i32_0 = arith.constant 0 : i32
    %c0_i32_1 = arith.constant 0 : i32
    return %c0_i32, %c0_i32_0 : i32, i32
  }
  func.func @transform_2(%arg0: i32) -> (i32, i32) {
    %c0_i32 = arith.constant 0 : i32
    %c0_i32_0 = arith.constant 0 : i32
    %c0_i32_1 = arith.constant 0 : i32
    return %c0_i32, %c0_i32_0 : i32, i32
  }
  func.func @transform_3(%arg0: i32) -> (i32, i32, i32) {
    %c0_i32 = arith.constant 0 : i32
    %c0_i32_0 = arith.constant 0 : i32
    %c0_i32_1 = arith.constant 0 : i32
    %c0_i32_2 = arith.constant 0 : i32
    return %c0_i32, %c0_i32_0, %c0_i32_1 : i32, i32, i32
  }
  func.func @transform_4(%arg0: i32) -> (i32, i32) {
    %c0_i32 = arith.constant 0 : i32
    %c0_i32_0 = arith.constant 0 : i32
    %c0_i32_1 = arith.constant 0 : i32
    return %c0_i32, %c0_i32_0 : i32, i32
  }
  func.func @transform_5(%arg0: i32) -> (i32, i32) {
    %c0_i32 = arith.constant 0 : i32
    %c0_i32_0 = arith.constant 0 : i32
    %c0_i32_1 = arith.constant 0 : i32
    return %c0_i32, %c0_i32_0 : i32, i32
  }
  func.func @transform_6(%arg0: i32) -> (i32, i32) {
    %c0_i32 = arith.constant 0 : i32
    %c0_i32_0 = arith.constant 0 : i32
    return %arg0, %c0_i32 : i32, i32
  }
}

</mosaic_0001>

<bundles_post_ra>
// kernel: tpu_custom_call.1
= control target key start
LH: loop header
LB: loop body
LE: loop exit
PB: predicated region body
PF: predicated region fallthrough
CT: control target
= control target key end

     0   :  { %11 = vsyncpa [#allocation3], 0  ;;  %s2172_s0 = inlined_call_operand.vmem [shape: f32[32,128], index: 0, kind: input, shape index: {}]   ;;  %s2173_s1 = inlined_call_operand.vmem [shape: f32[128,96], index: 1, kind: input, shape index: {}]   ;;  %s2174_s2 = inlined_call_operand.vmem [shape: f32[1,96], index: 2, kind: input, shape index: {}]   ;;  %s2175_s3 = inlined_call_operand.vmem [shape: f32[4,16,16], index: 3, kind: input, shape index: {}]   ;;  %s2176_s4 = inlined_call_operand.vmem [shape: f32[32,128], index: 4, kind: input, shape index: {}]   ;;  %s2177_s5 = inlined_call_operand.vmem [shape: f32[1,128], index: 5, kind: input, shape index: {}]   ;;  %s2178_s6 = inlined_call_operand.hbm [shape: f32[32,128], index: 6, kind: output, shape index: {}]  }
   0x1   :  { %13 = vsyncpa [#allocation3 + $0x1], 0  ;;  %s1883_s21 = smov 0   ;;  %s1885_s22 = smov 0  }
   0x2   :  { %s1887_s23 = smov 0   ;;  %s1889_s24 = smov 0  }
   0x3 LB: > { %s1904_s25 = sadd.s32 4294967295, %s1830_s24   ;;  %s1363_s26 = sadd.s32 4294967294, %s1830_s24   ;;  %s1830_s24 = sphi %s1889_s24, %s2186_s24   ;;  %s1826_s23 = sphi %s1887_s23, %s2185_s23   ;;  %s1822_s22 = sphi %s1885_s22, %s2184_s22   ;;  %s1818_s21 = sphi %s1883_s21, %s2183_s21  }
   0x4   : > { %s1908_s27 = sadd.s32 1, %s1830_s24   ;;  %s157_s28 = sadd.s32 1, %s1826_s23 }
   0x5   : > { %s154_s29 = ssub.s32 %s1830_s24, %s1908_s27  ;;  %p167_p0 = scmp.ne.s32.totalorder %s1826_s23, %s1822_s22 }
   0x6   : > { %p155_p1 = scmp.eq.s32.totalorder %s154_s29, 0  ;;  %p168_p2 = scmp.eq.s32.totalorder %s1904_s25, 1 }
   0x7   : > { %p173_p3 = scmp.ne.s32.totalorder %s1822_s22, %s1818_s21  ;;  %p174_p4 = scmp.eq.s32.totalorder %s1363_s26, 1 }
   0x8   : > { %s1919_s30 = scalar_select %p155_p1, %s1826_s23, %s157_s28  }
   0x9   : > { %p1921_p5 = por %p168_p2, %p167_p0  ;;  %p1925_p6 = por %p174_p4, %p173_p3 }
   0xa   : > { %p1366_p7 = scmp.ge.s32.totalorder %s1830_s24, 1  ;;  %p216_p8 = scmp.lt.s32.totalorder %s1830_s24, 3 }
   0xc   : > { %p217_p9 = pnand %p1366_p7, %p216_p8 }
   0xd   : > { %v255_v0 = vld [vmem:[%s2173_s1] sm:$0xff] (!%p217_p9)  ;;  %v256_v1 = vld [vmem:[%s2173_s1 + $0x8] sm:$0xff] (!%p217_p9)  ;;  %v257_v2 = vld [vmem:[%s2173_s1 + $0x10] sm:$0xff] (!%p217_p9)  ;;  %s1368_s15 = sshll.u32 (!%p217_p9), %s1904_s25, 1  ;;  %vm367_vm0 = vcmask (!%p217_p9), 64512   ;;  %vm451_vm2 = vcmask (!%p217_p9), 130048  }
   0xe   : > { %220 = sbr.rel (%p217_p9) target bundleno = 3105 (0xc21), region = 44  ;;  %v1562_v3 = vpack.c.bf16 (!%p217_p9), %v256_v1, %v255_v0  ;;  %v258_v4 = vld [vmem:[%s2173_s1 + $0x18] sm:$0xff] (!%p217_p9)  ;;  %p247_p10 = scmp.lt.s32.totalorder (!%p217_p9), %s1368_s15, 3  ;;  %v259_v6 = vld [vmem:[%s2173_s1 + $0x20] sm:$0xff] (!%p217_p9)  ;;  %v260_v7 = vld [vmem:[%s2173_s1 + $0x28] sm:$0xff] (!%p217_p9)  ;;  %vm1189_vm3 = vcmask (!%p217_p9), 195584  }
   0xf   : > { %v1566_v5 = vpack.c.bf16 (!%p217_p9), %v258_v4, %v257_v2  ;;  %v1570_v8 = vpack.c.bf16 (!%p217_p9), %v260_v7, %v259_v6  ;;  %v261_v9 = vld [vmem:[%s2173_s1 + $0x30] sm:$0xff] (!%p217_p9)  ;;  %v262_v10 = vld [vmem:[%s2173_s1 + $0x38] sm:$0xff] (!%p217_p9)  ;;  %v263_v13 = vld [vmem:[%s2173_s1 + $0x40] sm:$0xff] (!%p217_p9)  ;;  %s1833_s29 = smov (!%p217_p9), 64   ;;  %s1834_s9 = smov (!%p217_p9), 88   ;;  %vm1203_vm4 = vcmask (!%p217_p9), 261120  }
  0x10   : > { %1563 = vmatprep.subr.bf16.mxu0 (!%p217_p9), %v1562_v3  ;;  %v1574_v12 = vpack.c.bf16 (!%p217_p9), %v262_v10, %v261_v9  ;;  %v264_v14 = vld [vmem:[%s2173_s1 + $0x48] sm:$0xff] (!%p217_p9)  ;;  %v265_v16 = vld [vmem:[%s2173_s1 + $0x50] sm:$0xff] (!%p217_p9)  ;;  %v266_v17 = vld [vmem:[%s2173_s1 + $0x58] sm:$0xff] (!%p217_p9)  ;;  %s1835_s10 = smov (!%p217_p9), 120   ;;  %s1836_s17 = smov (!%p217_p9), 56  }
  0x11   : > { %1565 = vmatpush3.bf16.msra.mxu0 (!%p217_p9), %v1562_v3  ;;  %v1578_v15 = vpack.c.bf16 (!%p217_p9), %v264_v14, %v263_v13  ;;  %v1582_v18 = vpack.c.bf16 (!%p217_p9), %v266_v17, %v265_v16  ;;  %v267_v19 = vld [vmem:[%s2173_s1 + $0x60] sm:$0xff] (!%p217_p9)  ;;  %v268_v20 = vld [vmem:[%s2173_s1 + $0x68] sm:$0xff] (!%p217_p9)  ;;  %v269_v22 = vld [vmem:[%s2173_s1 + $0x70] sm:$0xff] (!%p217_p9)  ;;  %s1838_s18 = smov (!%p217_p9), 112   ;;  %s1842_s16 = smov (!%p217_p9), 8  }
  0x12   : > { %1567 = vmatprep.subr.bf16.mxu0 (!%p217_p9), %v1566_v5  ;;  %v1586_v21 = vpack.c.bf16 (!%p217_p9), %v268_v20, %v267_v19  ;;  %v270_v23 = vld [vmem:[%s2173_s1 + $0x78] sm:$0xff] (!%p217_p9)  ;;  %v1370_v26 = vld [vmem:[%s2174_s2] ss:$0 sm:$0xff] (!%p217_p9)  ;;  %vm1999_vm1 = vmpackc.low (!%p217_p9), %vm367_vm0, %vm367_vm0  ;;  %s243_s11 = sand.u32 (!%p217_p9), 1, %s1822_s22  }
  0x13   : > { %v1590_v24 = vpack.c.bf16 (!%p217_p9), %v270_v23, %v269_v22  ;;  %v354_v37 = vld [vmem:[%s2175_s3 + $0x8] sm:$0xff] (!%p217_p9)  ;;  %v353_v38 = vld [vmem:[%s2175_s3] sm:$0xff] (!%p217_p9)  ;;  %v356_v9 = vld [vmem:[%s2175_s3 + $0x18] sm:$0xff] (!%p217_p9)  ;;  %s1367_s12 = sshll.u32 (!%p217_p9), %s243_s11, 4 }
  0x14   : > { %v355_v10 = vld [vmem:[%s2175_s3 + $0x10] sm:$0xff] (!%p217_p9) }
  0x15   : > { %s2188_s15 = smov (!%p247_p10, %s1368_s15), 3  ;;  %1569 = vmatpush3.bf16.msra.mxu0 %v1566_v5 }
  0x16   : > { %s1369_s28 = sshll.u32 %s2188_s15, 3  ;;  %1571 = vmatprep.subr.bf16.mxu0 %v1570_v8  ;;  %s1837_s15 = smov 80  }
  0x17   : > { %s250_s14 = scalar_lea.vmem %s2172_s0, %s1369_s28  ;;  %s1839_s28 = smov 72  }
  0x18   : > { %v253_v11 = vld [vmem:[%s250_s14] sm:$0xff]  ;;  %v254_v25 = vld [vmem:[%s250_s14 + $0x8] sm:$0xff]  ;;  %s1832_s14 = smov 96  }
  0x19   : > { %1492 = vmatprep.mubr.f32.mxu0 %v253_v11  ;;  %1573 = vmatpush3.bf16.msra.mxu0 %v1570_v8 }
  0x1a   : > { %1575 = vmatprep.subr.bf16.mxu0 %v1574_v12 }
  0x1d   : > { %1577 = vmatpush3.bf16.msra.mxu0 %v1574_v12 }
  0x1e   : > { %1579 = vmatprep.subr.bf16.mxu0 %v1578_v15 }
  0x21   : > { %1581 = vmatpush3.bf16.msra.mxu0 %v1578_v15 }
  0x22   : > { %1583 = vmatprep.subr.bf16.mxu0 %v1582_v18 }
  0x25   : > { %1585 = vmatpush3.bf16.msra.mxu0 %v1582_v18 }
  0x26   : > { %1587 = vmatprep.subr.bf16.mxu0 %v1586_v21 }
  0x29   : > { %1589 = vmatpush3.bf16.msra.mxu0 %v1586_v21 }
  0x2a   : > { %1591 = vmatprep.subr.bf16.mxu0 %v1590_v24 }
  0x2d   : > { %1593 = vmatpush3.bf16.msra.mxu0 %v1590_v24 }
  0x30   : > { %1493 = vmatmul.mubr.f32.vlgmr.msra.gmra.mrb[0].mxu0 %v254_v25 }
 0x103   : > { %v1494_v27 = vpop.f32.mrb[0].mxu0 }
 0x104   : > { %v1986_v28 = vadd.f32 %v1494_v27, %v1370_v26  ;;  %v344_v29 = vpop.f32.mrb[1].mxu0 }
 0x105   : > { %v1988_v30 = vadd.f32 %v1370_v26, %v344_v29 }
 0x107   : > { %1499 = vmatprep.mubr.msk.f32.mxu1 %vm367_vm0, %v1988_v30  ;;  %v1994_v31 = vpack.i.bf16 %v1986_v28, %v1988_v30 }
 0x109   : > { %1697 = vrot.lane.b32.xlu0 %v1994_v31, %s1832_s14  ;;  %s1403_s14 = sshll.u32 %s1904_s25, 8  ;;  %s1846_s25 = smov [#allocation2]  }
 0x10a   : > { %s2128_s26 = scalar_lea.hbm %s2178_s6, %s1403_s14 }
 0x17b   : > { %v1698_v32 = vpop.permute.xlu0 %1697 }
 0x17c   : > { %v1700_v33 = vunpack.i.h.bf16 %v1698_v32  ;;  %v1699_v34 = vunpack.i.l.bf16 %v1698_v32 }
 0x17e   : > { %v1594_v36 = vpack.c.bf16 %v1700_v33, %v1699_v34 }
 0x180   : > { %1596 = vmatprep.subr.msk.bf16.mxu1 %vm1999_vm1, %v1594_v36 }
 0x181   : > { %1599 = vmatpush3.bf16.xpose.msk.msra.mxu1 %vm1999_vm1, %v1594_v36 }
 0x188   : > { %1500 = vmatmul.mubr.msk.f32.vlgmr.msra.gmra.mrb[0].mxu1 %vm367_vm0, %v1986_v28 }
 0x25b   : > { %v1501_v39 = vpop.f32.mrb[0].mxu1 }
 0x25c   : > { %v448_v40 = vadd.f32 %v1501_v39, %v354_v37  ;;  %v442_v41 = vpop.f32.mrb[1].mxu1 }
 0x25d   : > { %v443_v42 = vadd.f32 %v442_v41, %v353_v38 }
 0x25e   : > { %v455_v43 = vsel %vm451_vm2, %v448_v40, -inf }
 0x25f   : > { %456 = vmax.xlane.f32.xlu1 %v455_v43  ;;  %v452_v44 = vsel %vm451_vm2, %v443_v42, -inf }
 0x260   : > { %453 = vmax.xlane.f32.xlu0 %v452_v44 }
 0x270   : > { %1702 = vrot.lane.b32.xlu1 %v1994_v31, %s1833_s29  ;;  %s1840_s29 = smov 104  }
 0x274   : > { %1707 = vrot.lane.b32.xlu1 %v1994_v31, %s1834_s9  ;;  %s1841_s9 = smov 48  }
 0x276   : > { %563 = vrot.lane.b32.xlu0 %v1986_v28, %s1835_s10 }
 0x2ec   : > { %v457_v45 = vpop.xlane.xlu1 %456 }
 0x2ed   : > { %v459_v46 = vsub.f32 %v448_v40, %v457_v45  ;;  %v454_v47 = vpop.xlane.xlu0 %453 }
 0x2ee   : > { %v458_v48 = vsub.f32 %v443_v42, %v454_v47 }
 0x2ef   : > { %v462_v49 = vmul.f32 1.442695, %v459_v46 }
 0x2f0   : > { %v460_v50 = vmul.f32 1.442695, %v458_v48  ;;  %v1703_v51 = vpop.permute.xlu1 %1702 }
 0x2f1   : > { %1736 = vpow2.f32 %v462_v49  ;;  %v1705_v52 = vunpack.i.h.bf16 %v1703_v51  ;;  %v1704_v53 = vunpack.i.l.bf16 %v1703_v51  ;;  %v564_v6 = vpop.permute.xlu0 %563  ;;  %v358_v49 = vld [vmem:[%s2175_s3 + $0x28] sm:$0xff] }
 0x2f2   : > { %1738 = vpow2.f32 %v460_v50  ;;  %v357_v50 = vld [vmem:[%s2175_s3 + $0x20] sm:$0xff] }
 0x2f3   : > { %v1600_v54 = vpack.c.bf16 %v1705_v52, %v1704_v53 }
 0x2f4   : > { %v1708_v55 = vpop.permute.xlu1 %1707 }
 0x2f5   : > { %v1710_v56 = vunpack.i.h.bf16 %v1708_v55  ;;  %v1709_v57 = vunpack.i.l.bf16 %v1708_v55  ;;  %1601 = vmatprep.subr.bf16.mxu1 %v1600_v54 }
 0x2f6   : > { %1603 = vmatpush3.bf16.msra.mxu1 %v1600_v54 }
 0x2f7   : > { %v1604_v58 = vpack.c.bf16 %v1710_v56, %v1709_v57 }
 0x2f9   : > { %1606 = vmatprep.subr.msk.bf16.mxu1 %vm1999_vm1, %v1604_v58 }
 0x2fb   : > { %v1737_v59 = vpop.eup %1736 }
 0x2fc   : > { %v467_v60 = vsel %vm451_vm2, %v1737_v59, 0.0  ;;  %v1739_v61 = vpop.eup %1738 }
 0x2fd   : > { %468 = vadd.xlane.f32.xlu1 %v467_v60  ;;  %v464_v62 = vsel %vm451_vm2, %v1739_v61, 0.0 }
 0x301   : > { %465 = vadd.xlane.f32.xlu1 %v464_v62 }
 0x312   : > { %561 = vrot.lane.b32.xlu1 %v1988_v30, %s1835_s10  ;;  %s1845_s10 = smov 24  }
 0x38a   : > { %v469_v63 = vpop.xlane.xlu1 %468 }
 0x38b   : > { %1740 = vrcp.f32 %v469_v63 }
 0x38e   : > { %v466_v0 = vpop.xlane.xlu1 %465 }
 0x38f   : > { %1742 = vrcp.f32 %v466_v0 }
 0x392   : > { %v562_v5 = vpop.permute.xlu1 %561 }
 0x395   : > { %v1741_v1 = vpop.eup %1740 }
 0x396   : > { %v473_v4 = vmul.f32 %v1741_v1, %v1737_v59 }
 0x399   : > { %v1743_v2 = vpop.eup %1742 }
 0x39a   : > { %v472_v3 = vmul.f32 %v1743_v2, %v1739_v61 }
 0x39c   : > { %1506 = vmatprep.mubr.msk.f32.mxu1 %vm451_vm2, %v472_v3 }
 0x39d   : > { %1507 = vmatmul.mubr.msk.f32.vlgmr.msra.gmra.mrb[2].mxu1 %vm451_vm2, %v473_v4 }
 0x39e   : > { %1609 = vmatpush3.bf16.xpose.msk.msra.mxu1 %vm1999_vm1, %v1604_v58  ;;  %1513 = vmatprep.mubr.msk.f32.mxu1 %vm367_vm0, %v562_v5 }
 0x3a5   : > { %1514 = vmatmul.mubr.msk.f32.vlgmr.msra.gmra.mrb[4].mxu1 %vm367_vm0, %v564_v6 }
 0x470   : > { %v2031_v7 = vpop.f32.mrb[2].mxu1 }
 0x471   : > { %v2033_v8 = vpop.f32.mrb[3].mxu1 }
 0x478   : > { %v1515_v11 = vpop.f32.mrb[4].mxu1 }
 0x479   : > { %v649_v12 = vadd.f32 %v1515_v11, %v356_v9  ;;  %v643_v13 = vpop.f32.mrb[5].mxu1 }
 0x47a   : > { %v644_v14 = vadd.f32 %v643_v13, %v355_v10 }
 0x47b   : > { %v655_v15 = vsel %vm451_vm2, %v649_v12, -inf }
 0x47c   : > { %656 = vmax.xlane.f32.xlu0 %v655_v15  ;;  %v652_v16 = vsel %vm451_vm2, %v644_v14, -inf }
 0x47d   : > { %653 = vmax.xlane.f32.xlu1 %v652_v16 }
 0x48e   : > { %1712 = vrot.lane.b32.xlu1 %v1994_v31, %s1836_s17  ;;  %s1843_s17 = smov 40  }
 0x492   : > { %1717 = vrot.lane.b32.xlu0 %v1994_v31, %s1837_s15  ;;  %761 = vrot.lane.b32.xlu1 %v1988_v30, %s1838_s18  ;;  %s1844_s15 = smov 16  }
 0x509   : > { %v657_v17 = vpop.xlane.xlu0 %656 }
 0x50a   : > { %v659_v18 = vsub.f32 %v649_v12, %v657_v17  ;;  %v654_v19 = vpop.xlane.xlu1 %653 }
 0x50b   : > { %v658_v20 = vsub.f32 %v644_v14, %v654_v19 }
 0x50c   : > { %v662_v21 = vmul.f32 1.442695, %v659_v18 }
 0x50d   : > { %v660_v22 = vmul.f32 1.442695, %v658_v20  ;;  %v1718_v23 = vpop.permute.xlu0 %1717 }
 0x50e   : > { %1744 = vpow2.f32 %v662_v21  ;;  %v1713_v24 = vpop.permute.xlu1 %1712  ;;  %v1720_v25 = vunpack.i.h.bf16 %v1718_v23  ;;  %v1719_v26 = vunpack.i.l.bf16 %v1718_v23  ;;  %v360_v21 = vld [vmem:[%s2175_s3 + $0x38] sm:$0xff] }
 0x50f   : > { %v1715_v27 = vunpack.i.h.bf16 %v1713_v24  ;;  %v1714_v29 = vunpack.i.l.bf16 %v1713_v24  ;;  %1746 = vpow2.f32 %v660_v22  ;;  %v359_v22 = vld [vmem:[%s2175_s3 + $0x30] sm:$0xff] }
 0x510   : > { %v1614_v33 = vpack.c.bf16 %v1720_v25, %v1719_v26 }
 0x511   : > { %v1610_v32 = vpack.c.bf16 %v1715_v27, %v1714_v29 }
 0x512   : > { %v762_v39 = vpop.permute.xlu1 %761 }
 0x513   : > { %1611 = vmatprep.subr.bf16.mxu1 %v1610_v32 }
 0x514   : > { %1613 = vmatpush3.bf16.msra.mxu1 %v1610_v32 }
 0x515   : > { %1616 = vmatprep.subr.msk.bf16.mxu1 %vm1999_vm1, %v1614_v33 }
 0x518   : > { %v1745_v34 = vpop.eup %1744 }
 0x519   : > { %v667_v36 = vsel %vm451_vm2, %v1745_v34, 0.0  ;;  %v1747_v37 = vpop.eup %1746 }
 0x51a   : > { %668 = vadd.xlane.f32.xlu1 %v667_v36  ;;  %v664_v38 = vsel %vm451_vm2, %v1747_v37, 0.0 }
 0x51e   : > { %665 = vadd.xlane.f32.xlu1 %v664_v38 }
 0x52f   : > { %763 = vrot.lane.b32.xlu1 %v1986_v28, %s1838_s18 }
 0x5a7   : > { %v669_v40 = vpop.xlane.xlu1 %668 }
 0x5a8   : > { %1748 = vrcp.f32 %v669_v40 }
 0x5ab   : > { %v666_v41 = vpop.xlane.xlu1 %665 }
 0x5ac   : > { %1750 = vrcp.f32 %v666_v41 }
 0x5af   : > { %v764_v46 = vpop.permute.xlu1 %763 }
 0x5b2   : > { %v1749_v42 = vpop.eup %1748 }
 0x5b3   : > { %v673_v45 = vmul.f32 %v1749_v42, %v1745_v34 }
 0x5b6   : > { %v1751_v43 = vpop.eup %1750 }
 0x5b7   : > { %v672_v44 = vmul.f32 %v1751_v43, %v1747_v37 }
 0x5b9   : > { %1520 = vmatprep.mubr.msk.f32.mxu1 %vm451_vm2, %v672_v44 }
 0x5ba   : > { %1521 = vmatmul.mubr.msk.f32.vlgmr.msra.gmra.mrb[6].mxu1 %vm451_vm2, %v673_v45 }
 0x5bb   : > { %1619 = vmatpush3.bf16.xpose.msk.msra.mxu1 %vm1999_vm1, %v1614_v33  ;;  %1527 = vmatprep.mubr.msk.f32.mxu1 %vm367_vm0, %v762_v39 }
 0x5c2   : > { %1528 = vmatmul.mubr.msk.f32.vlgmr.msra.gmra.mrb[8].mxu1 %vm367_vm0, %v764_v46 }
 0x68d   : > { %v2057_v47 = vpop.f32.mrb[6].mxu1 }
 0x68e   : > { %v2059_v48 = vpop.f32.mrb[7].mxu1 }
 0x695   : > { %v1529_v51 = vpop.f32.mrb[8].mxu1 }
 0x696   : > { %v849_v52 = vadd.f32 %v1529_v51, %v358_v49  ;;  %v843_v53 = vpop.f32.mrb[9].mxu1 }
 0x697   : > { %v844_v54 = vadd.f32 %v843_v53, %v357_v50  ;;  %v1194_v53 = vld [vmem:[%s2176_s4 + $0x10] sm:$0xff] }
 0x698   : > { %v855_v55 = vsel %vm451_vm2, %v849_v52, -inf }
 0x699   : > { %856 = vmax.xlane.f32.xlu0 %v855_v55  ;;  %v852_v56 = vsel %vm451_vm2, %v844_v54, -inf  ;;  %v1195_v55 = vld [vmem:[%s2176_s4 + $0x18] sm:$0xff] }
 0x69a   : > { %853 = vmax.xlane.f32.xlu1 %v852_v56  ;;  %v1638_v56 = vpack.c.bf16 %v1195_v55, %v1194_v53 }
 0x726   : > { %v857_v57 = vpop.xlane.xlu0 %856 }
 0x727   : > { %v859_v58 = vsub.f32 %v849_v52, %v857_v57  ;;  %v854_v59 = vpop.xlane.xlu1 %853  ;;  %v1193_v52 = vld [vmem:[%s2176_s4 + $0x8] sm:$0xff] }
 0x728   : > { %v858_v60 = vsub.f32 %v844_v54, %v854_v59 }
 0x729   : > { %v862_v61 = vmul.f32 1.442695, %v859_v58 }
 0x72a   : > { %v860_v62 = vmul.f32 1.442695, %v858_v60 }
 0x72b   : > { %1752 = vpow2.f32 %v862_v61 }
 0x72c   : > { %1754 = vpow2.f32 %v860_v62 }
 0x735   : > { %v1753_v63 = vpop.eup %1752 }
 0x736   : > { %v1755_v0 = vpop.eup %1754  ;;  %v867_v1 = vsel %vm451_vm2, %v1753_v63, 0.0 }
 0x737   : > { %868 = vadd.xlane.f32.xlu1 %v867_v1  ;;  %v864_v2 = vsel %vm451_vm2, %v1755_v0, 0.0 }
 0x738   : > { %865 = vadd.xlane.f32.xlu0 %v864_v2 }
 0x748   : > { %1727 = vrot.lane.b32.xlu1 %v1994_v31, %s1839_s28  ;;  %s2130_s28 = scalar_lea.sflag [#allocation3], %s243_s11 }
 0x74c   : > { %961 = vrot.lane.b32.xlu1 %v1988_v30, %s1840_s29 }
 0x74e   : > { %1722 = vrot.lane.b32.xlu0 %v1994_v31, %s1841_s9  ;;  %s1772_s9 = sshll.u32 %s1846_s25, 4  ;;  %s1773_s9 = int_to_ptr.vmem [resolvable:$false] %s1772_s9 }
 0x752   : > { %963 = vrot.lane.b32.xlu0 %v1986_v28, %s1840_s29 }
 0x7c4   : > { %v869_v3 = vpop.xlane.xlu1 %868 }
 0x7c5   : > { %1756 = vrcp.f32 %v869_v3  ;;  %v866_v4 = vpop.xlane.xlu0 %865 }
 0x7c6   : > { %1758 = vrcp.f32 %v866_v4 }
 0x7c8   : > { %v1728_v5 = vpop.permute.xlu1 %1727 }
 0x7c9   : > { %v1723_v6 = vpop.permute.xlu0 %1722  ;;  %v1730_v9 = vunpack.i.h.bf16 %v1728_v5  ;;  %v1729_v10 = vunpack.i.l.bf16 %v1728_v5 }
 0x7ca   : > { %v1725_v11 = vunpack.i.h.bf16 %v1723_v6  ;;  %v1724_v12 = vunpack.i.l.bf16 %v1723_v6 }
 0x7cb   : > { %v1624_v14 = vpack.c.bf16 %v1730_v9, %v1729_v10 }
 0x7cc   : > { %v1620_v13 = vpack.c.bf16 %v1725_v11, %v1724_v12  ;;  %v962_v17 = vpop.permute.xlu1 %961 }
 0x7cd   : > { %v964_v18 = vpop.permute.xlu0 %963 }
 0x7ce   : > { %1621 = vmatprep.subr.bf16.mxu1 %v1620_v13 }
 0x7cf   : > { %v1757_v15 = vpop.eup %1756  ;;  %1623 = vmatpush3.bf16.msra.mxu1 %v1620_v13 }
 0x7d0   : > { %v1759_v30 = vpop.eup %1758  ;;  %1626 = vmatprep.subr.msk.bf16.mxu1 %vm1999_vm1, %v1624_v14  ;;  %v873_v16 = vmul.f32 %v1757_v15, %v1753_v63 }
 0x7d1   : > { %v872_v28 = vmul.f32 %v1759_v30, %v1755_v0 }
 0x7d3   : > { %1534 = vmatprep.mubr.msk.f32.mxu1 %vm451_vm2, %v872_v28 }
 0x7d4   : > { %1535 = vmatmul.mubr.msk.f32.vlgmr.msra.gmra.mrb[10].mxu1 %vm451_vm2, %v873_v16 }
 0x7d5   : > { %1541 = vmatprep.mubr.msk.f32.mxu1 %vm367_vm0, %v962_v17 }
 0x7d8   : > { %1629 = vmatpush3.bf16.xpose.msk.msra.mxu1 %vm1999_vm1, %v1624_v14 }
 0x7df   : > { %1542 = vmatmul.mubr.msk.f32.vlgmr.msra.gmra.mrb[12].mxu1 %vm367_vm0, %v964_v18 }
 0x8a7   : > { %v1536_v19 = vpop.f32.mrb[10].mxu1 }
 0x8a8   : > { %v952_v20 = vpop.f32.mrb[11].mxu1 }
 0x8b2   : > { %v1543_v23 = vpop.f32.mrb[12].mxu1 }
 0x8b3   : > { %v1049_v24 = vadd.f32 %v1543_v23, %v360_v21  ;;  %v1043_v25 = vpop.f32.mrb[13].mxu1 }
 0x8b4   : > { %v1044_v26 = vadd.f32 %v1043_v25, %v359_v22 }
 0x8b5   : > { %v1055_v35 = vsel %vm451_vm2, %v1049_v24, -inf }
 0x8b6   : > { %1056 = vmax.xlane.f32.xlu0 %v1055_v35  ;;  %v1052_v27 = vsel %vm451_vm2, %v1044_v26, -inf }
 0x8b7   : > { %1053 = vmax.xlane.f32.xlu1 %v1052_v27 }
 0x943   : > { %v1057_v29 = vpop.xlane.xlu0 %1056 }
 0x944   : > { %v1059_v32 = vsub.f32 %v1049_v24, %v1057_v29  ;;  %v1054_v33 = vpop.xlane.xlu1 %1053 }
 0x945   : > { %v1058_v34 = vsub.f32 %v1044_v26, %v1054_v33 }
 0x946   : > { %v1062_v36 = vmul.f32 1.442695, %v1059_v32 }
 0x947   : > { %v1060_v37 = vmul.f32 1.442695, %v1058_v34 }
 0x948   : > { %1760 = vpow2.f32 %v1062_v36 }
 0x949   : > { %1762 = vpow2.f32 %v1060_v37 }
 0x952   : > { %v1761_v38 = vpop.eup %1760 }
 0x953   : > { %v1763_v39 = vpop.eup %1762  ;;  %v1067_v40 = vsel %vm451_vm2, %v1761_v38, 0.0 }
 0x954   : > { %1068 = vadd.xlane.f32.xlu1 %v1067_v40  ;;  %v1064_v41 = vsel %vm451_vm2, %v1763_v39, 0.0 }
 0x955   : > { %1065 = vadd.xlane.f32.xlu0 %v1064_v41 }
 0x965   : > { %1163 = vrot.lane.b32.xlu1 %v2059_v48, %s1842_s16 }
 0x969   : > { %1165 = vrot.lane.b32.xlu1 %v2057_v47, %s1842_s16 }
 0x96b   : > { %1732 = vrot.lane.b32.xlu0 %v1994_v31, %s1843_s17  ;;  %v1192_v31 = vld [vmem:[%s2176_s4] sm:$0xff] }
 0x96c   : > { %v1634_v54 = vpack.c.bf16 %v1193_v52, %v1192_v31 }
 0x96d   : > { %1173 = vrot.lane.b32.xlu1 %v1536_v19, %s1844_s15 }
 0x96f   : > { %1171 = vrot.lane.b32.xlu0 %v952_v20, %s1844_s15  ;;  %s245_s15 = scalar_lea.vmem [#allocation2], %s1367_s12 }
 0x970   : > { %s1301_s18 = sshll.u32 %s245_s15, 4  ;;  %s2123_s18 = int_to_ptr.vmem [resolvable:$true] %s1301_s18 }
 0x971   : > { %s1768_s29 = scalar_lea.vmem %s2123_s18, 256  ;;  %p1775_p0 = scmp.lt.s32.totalorder %s2123_s18, %s1773_s9 }
 0x972   : > { %p1769_p11 = scmp.ne.s32.totalorder %s2123_s18, %s1768_s29 }
 0x974   : > { %p1770_p12 = pnand %p1769_p11, %p1921_p5 }
 0x976   : > { %p1771_p13 = pneg %p1770_p12 }
 0x9e1   : > { %v1069_v42 = vpop.xlane.xlu1 %1068 }
 0x9e2   : > { %1764 = vrcp.f32 %v1069_v42  ;;  %v1066_v43 = vpop.xlane.xlu0 %1065 }
 0x9e3   : > { %1766 = vrcp.f32 %v1066_v43 }
 0x9e5   : > { %v1164_v59 = vpop.permute.xlu1 %1163 }
 0x9e6   : > { %v1733_v44 = vpop.permute.xlu0 %1732  ;;  %v1185_v63 = vsel %vm367_vm0, %v2033_v8, %v1164_v59  ;;  %v1395_v8 = vld [vmem:[%s2177_s5] ss:$0 sm:$0xff] }
 0x9e7   : > { %v1735_v45 = vunpack.i.h.bf16 %v1733_v44  ;;  %v1734_v46 = vunpack.i.l.bf16 %v1733_v44 }
 0x9e9   : > { %v1630_v49 = vpack.c.bf16 %v1735_v45, %v1734_v46  ;;  %v1166_v60 = vpop.permute.xlu1 %1165 }
 0x9ea   : > { %v1172_v62 = vpop.permute.xlu0 %1171  ;;  %v1186_v1 = vsel %vm367_vm0, %v2031_v7, %v1166_v60 }
 0x9eb   : > { %1631 = vmatprep.subr.bf16.mxu0 %v1630_v49  ;;  %v1187_v2 = vsel %vm451_vm2, %v1185_v63, %v1172_v62 }
 0x9ec   : > { %v1765_v50 = vpop.eup %1764  ;;  %1633 = vmatpush3.bf16.msra.mxu0 %v1630_v49 }
 0x9ed   : > { %v1767_v48 = vpop.eup %1766  ;;  %v1073_v47 = vmul.f32 %v1765_v50, %v1761_v38  ;;  %1635 = vmatprep.subr.bf16.mxu0 %v1634_v54  ;;  %v1174_v61 = vpop.permute.xlu1 %1173 }
 0x9ee   : > { %v1072_v51 = vmul.f32 %v1767_v48, %v1763_v39  ;;  %v1188_v4 = vsel %vm451_vm2, %v1186_v1, %v1174_v61 }
 0x9f0   : > { %1548 = vmatprep.mubr.msk.f32.mxu0 %vm451_vm2, %v1072_v51 }
 0x9f1   : > { %1549 = vmatmul.mubr.msk.f32.vlgmr.msra.gmra.mrb[2].mxu0 %vm451_vm2, %v1073_v47 }
 0x9f2   : > { %1637 = vmatpush3.bf16.msra.mxu0 %v1634_v54 }
 0x9f3   : > { %1639 = vmatprep.subr.bf16.mxu0 %v1638_v56 }
 0x9f6   : > { %1641 = vmatpush3.bf16.msra.mxu0 %v1638_v56 }
 0xac4   : > { %v1550_v57 = vpop.f32.mrb[2].mxu0 }
 0xac5   : > { %1181 = vrot.lane.b32.xlu1 %v1550_v57, %s1845_s10  ;;  %v1152_v58 = vpop.f32.mrb[3].mxu0 }
 0xac6   : > { %1179 = vrot.lane.b32.xlu0 %v1152_v58, %s1845_s10  ;;  %s1774_s10 = scalar_lea.vmem %s1773_s9, 512 }
 0xac7   : > { %p1776_p1 = scmp.lt.s32.totalorder %s1774_s10, %s1768_s29 }
 0xac9   : > { %p1777_p2 = por %p1776_p1, %p1775_p0 }
 0xacb   : > { %p1778_p3 = pnand %p1777_p2, %p1771_p13 }
 0xb37   : > { %v1182_v0 = vpop.permute.xlu1 %1181 }
 0xb38   : > { %v1180_v3 = vpop.permute.xlu0 %1179  ;;  %v1191_v6 = vsel %vm1189_vm3, %v1188_v4, %v1182_v0 }
 0xb39   : > { %v1190_v5 = vsel %vm1189_vm3, %v1187_v2, %v1180_v3 }
 0xb3a   : > { %1559 = vmatprep.mubr.msk.f32.mxu0 %vm1203_vm4, %v1190_v5 }
 0xb3b   : > { %1560 = vmatmul.mubr.msk.f32.vlgmr.msra.gmra.mrb[4].mxu0 %vm1203_vm4, %v1191_v6 }
 0xc0e   : > { %v1561_v7 = vpop.f32.mrb[4].mxu0 }
 0xc0f   : > { %v1282_v9 = vadd.f32 %v1561_v7, %v1395_v8  ;;  %v1276_v10 = vpop.f32.mrb[5].mxu0 }
 0xc10   : > { %v1277_v11 = vadd.f32 %v1395_v8, %v1276_v10 }
 0xc11   : > { %1286 = vst [vmem:[%s245_s15 + $0x8] sm:$0xff] %v1282_v9 }
 0xc12   : > { %1285 = vst [vmem:[%s245_s15] sm:$0xff] %v1277_v11 }
 0xc13   : > { %1781 = shalt.err (!%p1778_p3)
}
 0xc14   : > { %s1782_s11 = scalar_lea.hbm %s2128_s26, 256  ;;  %s1786_s17 = scalar_lea.hbm %s2178_s6, 512 }
 0xc15   : > { %p1783_p4 = scmp.ne.s32.totalorder %s2128_s26, %s1782_s11  ;;  %p1787_p9 = scmp.lt.u32.totalorder %s2128_s26, %s2178_s6 }
 0xc16   : > { %p1788_p10 = scmp.lt.u32.totalorder %s1786_s17, %s1782_s11  ;;  %p1790_p12 = scmp.lt.u32.totalorder %s1782_s11, %s2128_s26 }
 0xc17   : > { %p1784_p7 = pnand %p1783_p4, %p1921_p5 }
 0xc18   : > { %p1789_p11 = por %p1788_p10, %p1787_p9 }
 0xc19   : > { %p1785_p8 = pneg %p1784_p7 }
 0xc1a   : > { %p1791_p13 = por %p1790_p12, %p1789_p11 }
 0xc1c   : > { %p1792_p0 = pnand %p1791_p13, %p1785_p8 }
 0xc1e   : > { %1795 = shalt.err (!%p1792_p0)
}
 0xc1f   : > { %s1847_s19 = smov 128  }
 0xc20   : > { %1642 = dma.vmem_to_hbm [thread:$0]  (%p1921_p5), %s2123_s18, 256, %s2128_s26, %s2130_s28, %s1847_s19, %s1847_s19, %s1842_s16  }
 0xc21 PF: > { %p1648_p1 = scmp.ge.s32.totalorder %s1830_s24, 2  ;;  %s1316_s20 = sand.u32 1, %s1818_s21  }
 0xc22   : > { %s1317_s29 = scalar_lea.sflag [#allocation3], %s1316_s20 }
 0xc23   : > { %p1645_p2 = pnand %p1648_p1, %p1925_p6 }
 0xc25   : > { %1813 = dma.done.wait (!%p1645_p2), %s1317_s29, 256  }
 0xc26   : > { %1815 = vsyncadd (!%p1645_p2), %s1317_s29, 4294967040  ;;  %p16_p3 = scmp.ge.s32.totalorder %s1908_s27, 4   ;;  %s2183_s21 = smov %s1822_s22 }
 0xc27   : > { %s2184_s22 = smov %s1826_s23  ;;  %s2185_s23 = smov %s1919_s30 }
 0xc28   : > { %s2186_s24 = smov %s1908_s27  ;;  %18 = sbr.rel (!%p16_p3) target bundleno = 3 (0x3), region = 79 }
 0xc2f   :  { %1322 = vsyncpa [#allocation3], 1 }
 0xc30   :  { %1324 = vsyncpa [#allocation3 + $0x1], 1 }

// kernel: tpu_custom_call.1
= control target key start
LH: loop header
LB: loop body
LE: loop exit
PB: predicated region body
PF: predicated region fallthrough
CT: control target
= control target key end

     0   :  { %11 = vsyncpa [#allocation3], 0  ;;  %s2172_s0 = inlined_call_operand.vmem [shape: f32[32,128], index: 0, kind: input, shape index: {}]   ;;  %s2173_s1 = inlined_call_operand.vmem [shape: f32[128,96], index: 1, kind: input, shape index: {}]   ;;  %s2174_s2 = inlined_call_operand.vmem [shape: f32[1,96], index: 2, kind: input, shape index: {}]   ;;  %s2175_s3 = inlined_call_operand.vmem [shape: f32[4,16,16], index: 3, kind: input, shape index: {}]   ;;  %s2176_s4 = inlined_call_operand.vmem [shape: f32[32,128], index: 4, kind: input, shape index: {}]   ;;  %s2177_s5 = inlined_call_operand.vmem [shape: f32[1,128], index: 5, kind: input, shape index: {}]   ;;  %s2178_s6 = inlined_call_operand.hbm [shape: f32[32,128], index: 6, kind: output, shape index: {}]  }
   0x1   :  { %13 = vsyncpa [#allocation3 + $0x1], 0  ;;  %s1883_s21 = smov 0   ;;  %s1885_s22 = smov 0  }
   0x2   :  { %s1887_s23 = smov 0   ;;  %s1889_s24 = smov 0  }
   0x3 LB: > { %s1904_s25 = sadd.s32 4294967295, %s1830_s24   ;;  %s1363_s26 = sadd.s32 4294967294, %s1830_s24   ;;  %s1830_s24 = sphi %s1889_s24, %s2186_s24   ;;  %s1826_s23 = sphi %s1887_s23, %s2185_s23   ;;  %s1822_s22 = sphi %s1885_s22, %s2184_s22   ;;  %s1818_s21 = sphi %s1883_s21, %s2183_s21  }
   0x4   : > { %s1908_s27 = sadd.s32 1, %s1830_s24   ;;  %s157_s28 = sadd.s32 1, %s1826_s23 }
   0x5   : > { %s154_s29 = ssub.s32 %s1830_s24, %s1908_s27  ;;  %p167_p0 = scmp.ne.s32.totalorder %s1826_s23, %s1822_s22 }
   0x6   : > { %p155_p1 = scmp.eq.s32.totalorder %s154_s29, 0  ;;  %p168_p2 = scmp.eq.s32.totalorder %s1904_s25, 1 }
   0x7   : > { %p173_p3 = scmp.ne.s32.totalorder %s1822_s22, %s1818_s21  ;;  %p174_p4 = scmp.eq.s32.totalorder %s1363_s26, 1 }
   0x8   : > { %s1919_s30 = scalar_select %p155_p1, %s1826_s23, %s157_s28  }
   0x9   : > { %p1921_p5 = por %p168_p2, %p167_p0  ;;  %p1925_p6 = por %p174_p4, %p173_p3 }
   0xa   : > { %p1366_p7 = scmp.ge.s32.totalorder %s1830_s24, 1  ;;  %p216_p8 = scmp.lt.s32.totalorder %s1830_s24, 3 }
   0xc   : > { %p217_p9 = pnand %p1366_p7, %p216_p8 }
   0xd   : > { %v255_v0 = vld [vmem:[%s2173_s1] sm:$0xff] (!%p217_p9)  ;;  %v256_v1 = vld [vmem:[%s2173_s1 + $0x8] sm:$0xff] (!%p217_p9)  ;;  %v257_v2 = vld [vmem:[%s2173_s1 + $0x10] sm:$0xff] (!%p217_p9)  ;;  %s1368_s15 = sshll.u32 (!%p217_p9), %s1904_s25, 1  ;;  %vm367_vm0 = vcmask (!%p217_p9), 64512   ;;  %vm451_vm2 = vcmask (!%p217_p9), 130048  }
   0xe   : > { %220 = sbr.rel (%p217_p9) target bundleno = 3105 (0xc21), region = 44  ;;  %v1562_v3 = vpack.c.bf16 (!%p217_p9), %v256_v1, %v255_v0  ;;  %v258_v4 = vld [vmem:[%s2173_s1 + $0x18] sm:$0xff] (!%p217_p9)  ;;  %p247_p10 = scmp.lt.s32.totalorder (!%p217_p9), %s1368_s15, 3  ;;  %v259_v6 = vld [vmem:[%s2173_s1 + $0x20] sm:$0xff] (!%p217_p9)  ;;  %v260_v7 = vld [vmem:[%s2173_s1 + $0x28] sm:$0xff] (!%p217_p9)  ;;  %vm1189_vm3 = vcmask (!%p217_p9), 195584  }
   0xf   : > { %v1566_v5 = vpack.c.bf16 (!%p217_p9), %v258_v4, %v257_v2  ;;  %v1570_v8 = vpack.c.bf16 (!%p217_p9), %v260_v7, %v259_v6  ;;  %v261_v9 = vld [vmem:[%s2173_s1 + $0x30] sm:$0xff] (!%p217_p9)  ;;  %v262_v10 = vld [vmem:[%s2173_s1 + $0x38] sm:$0xff] (!%p217_p9)  ;;  %v263_v13 = vld [vmem:[%s2173_s1 + $0x40] sm:$0xff] (!%p217_p9)  ;;  %s1833_s29 = smov (!%p217_p9), 64   ;;  %s1834_s9 = smov (!%p217_p9), 88   ;;  %vm1203_vm4 = vcmask (!%p217_p9), 261120  }
  0x10   : > { %1563 = vmatprep.subr.bf16.mxu0 (!%p217_p9), %v1562_v3  ;;  %v1574_v12 = vpack.c.bf16 (!%p217_p9), %v262_v10, %v261_v9  ;;  %v264_v14 = vld [vmem:[%s2173_s1 + $0x48] sm:$0xff] (!%p217_p9)  ;;  %v265_v16 = vld [vmem:[%s2173_s1 + $0x50] sm:$0xff] (!%p217_p9)  ;;  %v266_v17 = vld [vmem:[%s2173_s1 + $0x58] sm:$0xff] (!%p217_p9)  ;;  %s1835_s10 = smov (!%p217_p9), 120   ;;  %s1836_s17 = smov (!%p217_p9), 56  }
  0x11   : > { %1565 = vmatpush3.bf16.msra.mxu0 (!%p217_p9), %v1562_v3  ;;  %v1578_v15 = vpack.c.bf16 (!%p217_p9), %v264_v14, %v263_v13  ;;  %v1582_v18 = vpack.c.bf16 (!%p217_p9), %v266_v17, %v265_v16  ;;  %v267_v19 = vld [vmem:[%s2173_s1 + $0x60] sm:$0xff] (!%p217_p9)  ;;  %v268_v20 = vld [vmem:[%s2173_s1 + $0x68] sm:$0xff] (!%p217_p9)  ;;  %v269_v22 = vld [vmem:[%s2173_s1 + $0x70] sm:$0xff] (!%p217_p9)  ;;  %s1838_s18 = smov (!%p217_p9), 112   ;;  %s1842_s16 = smov (!%p217_p9), 8  }
  0x12   : > { %1567 = vmatprep.subr.bf16.mxu0 (!%p217_p9), %v1566_v5  ;;  %v1586_v21 = vpack.c.bf16 (!%p217_p9), %v268_v20, %v267_v19  ;;  %v270_v23 = vld [vmem:[%s2173_s1 + $0x78] sm:$0xff] (!%p217_p9)  ;;  %v1370_v26 = vld [vmem:[%s2174_s2] ss:$0 sm:$0xff] (!%p217_p9)  ;;  %vm1999_vm1 = vmpackc.low (!%p217_p9), %vm367_vm0, %vm367_vm0  ;;  %s243_s11 = sand.u32 (!%p217_p9), 1, %s1822_s22  }
  0x13   : > { %v1590_v24 = vpack.c.bf16 (!%p217_p9), %v270_v23, %v269_v22  ;;  %v354_v37 = vld [vmem:[%s2175_s3 + $0x8] sm:$0xff] (!%p217_p9)  ;;  %v353_v38 = vld [vmem:[%s2175_s3] sm:$0xff] (!%p217_p9)  ;;  %v356_v9 = vld [vmem:[%s2175_s3 + $0x18] sm:$0xff] (!%p217_p9)  ;;  %s1367_s12 = sshll.u32 (!%p217_p9), %s243_s11, 4 }
  0x14   : > { %v355_v10 = vld [vmem:[%s2175_s3 + $0x10] sm:$0xff] (!%p217_p9) }
  0x15   : > { %s2188_s15 = smov (!%p247_p10, %s1368_s15), 3  ;;  %1569 = vmatpush3.bf16.msra.mxu0 %v1566_v5 }
  0x16   : > { %s1369_s28 = sshll.u32 %s2188_s15, 3  ;;  %1571 = vmatprep.subr.bf16.mxu0 %v1570_v8  ;;  %s1837_s15 = smov 80  }
  0x17   : > { %s250_s14 = scalar_lea.vmem %s2172_s0, %s1369_s28  ;;  %s1839_s28 = smov 72  }
  0x18   : > { %v253_v11 = vld [vmem:[%s250_s14] sm:$0xff]  ;;  %v254_v25 = vld [vmem:[%s250_s14 + $0x8] sm:$0xff]  ;;  %s1832_s14 = smov 96  }
  0x19   : > { %1492 = vmatprep.mubr.f32.mxu0 %v253_v11  ;;  %1573 = vmatpush3.bf16.msra.mxu0 %v1570_v8 }
  0x1a   : > { %1575 = vmatprep.subr.bf16.mxu0 %v1574_v12 }
  0x1d   : > { %1577 = vmatpush3.bf16.msra.mxu0 %v1574_v12 }
  0x1e   : > { %1579 = vmatprep.subr.bf16.mxu0 %v1578_v15 }
  0x21   : > { %1581 = vmatpush3.bf16.msra.mxu0 %v1578_v15 }
  0x22   : > { %1583 = vmatprep.subr.bf16.mxu0 %v1582_v18 }
  0x25   : > { %1585 = vmatpush3.bf16.msra.mxu0 %v1582_v18 }
  0x26   : > { %1587 = vmatprep.subr.bf16.mxu0 %v1586_v21 }
  0x29   : > { %1589 = vmatpush3.bf16.msra.mxu0 %v1586_v21 }
  0x2a   : > { %1591 = vmatprep.subr.bf16.mxu0 %v1590_v24 }
  0x2d   : > { %1593 = vmatpush3.bf16.msra.mxu0 %v1590_v24 }
  0x30   : > { %1493 = vmatmul.mubr.f32.vlgmr.msra.gmra.mrb[0].mxu0 %v254_v25 }
 0x103   : > { %v1494_v27 = vpop.f32.mrb[0].mxu0 }
 0x104   : > { %v1986_v28 = vadd.f32 %v1494_v27, %v1370_v26  ;;  %v344_v29 = vpop.f32.mrb[1].mxu0 }
 0x105   : > { %v1988_v30 = vadd.f32 %v1370_v26, %v344_v29 }
 0x107   : > { %1499 = vmatprep.mubr.msk.f32.mxu1 %vm367_vm0, %v1988_v30  ;;  %v1994_v31 = vpack.i.bf16 %v1986_v28, %v1988_v30 }
 0x109   : > { %1697 = vrot.lane.b32.xlu0 %v1994_v31, %s1832_s14  ;;  %s1403_s14 = sshll.u32 %s1904_s25, 8  ;;  %s1846_s25 = smov [#allocation2]  }
 0x10a   : > { %s2128_s26 = scalar_lea.hbm %s2178_s6, %s1403_s14 }
 0x17b   : > { %v1698_v32 = vpop.permute.xlu0 %1697 }
 0x17c   : > { %v1700_v33 = vunpack.i.h.bf16 %v1698_v32  ;;  %v1699_v34 = vunpack.i.l.bf16 %v1698_v32 }
 0x17e   : > { %v1594_v36 = vpack.c.bf16 %v1700_v33, %v1699_v34 }
 0x180   : > { %1596 = vmatprep.subr.msk.bf16.mxu1 %vm1999_vm1, %v1594_v36 }
 0x181   : > { %1599 = vmatpush3.bf16.xpose.msk.msra.mxu1 %vm1999_vm1, %v1594_v36 }
 0x188   : > { %1500 = vmatmul.mubr.msk.f32.vlgmr.msra.gmra.mrb[0].mxu1 %vm367_vm0, %v1986_v28 }
 0x25b   : > { %v1501_v39 = vpop.f32.mrb[0].mxu1 }
 0x25c   : > { %v448_v40 = vadd.f32 %v1501_v39, %v354_v37  ;;  %v442_v41 = vpop.f32.mrb[1].mxu1 }
 0x25d   : > { %v443_v42 = vadd.f32 %v442_v41, %v353_v38 }
 0x25e   : > { %v455_v43 = vsel %vm451_vm2, %v448_v40, -inf }
 0x25f   : > { %456 = vmax.xlane.f32.xlu1 %v455_v43  ;;  %v452_v44 = vsel %vm451_vm2, %v443_v42, -inf }
 0x260   : > { %453 = vmax.xlane.f32.xlu0 %v452_v44 }
 0x270   : > { %1702 = vrot.lane.b32.xlu1 %v1994_v31, %s1833_s29  ;;  %s1840_s29 = smov 104  }
 0x274   : > { %1707 = vrot.lane.b32.xlu1 %v1994_v31, %s1834_s9  ;;  %s1841_s9 = smov 48  }
 0x276   : > { %563 = vrot.lane.b32.xlu0 %v1986_v28, %s1835_s10 }
 0x2ec   : > { %v457_v45 = vpop.xlane.xlu1 %456 }
 0x2ed   : > { %v459_v46 = vsub.f32 %v448_v40, %v457_v45  ;;  %v454_v47 = vpop.xlane.xlu0 %453 }
 0x2ee   : > { %v458_v48 = vsub.f32 %v443_v42, %v454_v47 }
 0x2ef   : > { %v462_v49 = vmul.f32 1.442695, %v459_v46 }
 0x2f0   : > { %v460_v50 = vmul.f32 1.442695, %v458_v48  ;;  %v1703_v51 = vpop.permute.xlu1 %1702 }
 0x2f1   : > { %1736 = vpow2.f32 %v462_v49  ;;  %v1705_v52 = vunpack.i.h.bf16 %v1703_v51  ;;  %v1704_v53 = vunpack.i.l.bf16 %v1703_v51  ;;  %v564_v6 = vpop.permute.xlu0 %563  ;;  %v358_v49 = vld [vmem:[%s2175_s3 + $0x28] sm:$0xff] }
 0x2f2   : > { %1738 = vpow2.f32 %v460_v50  ;;  %v357_v50 = vld [vmem:[%s2175_s3 + $0x20] sm:$0xff] }
 0x2f3   : > { %v1600_v54 = vpack.c.bf16 %v1705_v52, %v1704_v53 }
 0x2f4   : > { %v1708_v55 = vpop.permute.xlu1 %1707 }
 0x2f5   : > { %v1710_v56 = vunpack.i.h.bf16 %v1708_v55  ;;  %v1709_v57 = vunpack.i.l.bf16 %v1708_v55  ;;  %1601 = vmatprep.subr.bf16.mxu1 %v1600_v54 }
 0x2f6   : > { %1603 = vmatpush3.bf16.msra.mxu1 %v1600_v54 }
 0x2f7   : > { %v1604_v58 = vpack.c.bf16 %v1710_v56, %v1709_v57 }
 0x2f9   : > { %1606 = vmatprep.subr.msk.bf16.mxu1 %vm1999_vm1, %v1604_v58 }
 0x2fb   : > { %v1737_v59 = vpop.eup %1736 }
 0x2fc   : > { %v467_v60 = vsel %vm451_vm2, %v1737_v59, 0.0  ;;  %v1739_v61 = vpop.eup %1738 }
 0x2fd   : > { %468 = vadd.xlane.f32.xlu1 %v467_v60  ;;  %v464_v62 = vsel %vm451_vm2, %v1739_v61, 0.0 }
 0x301   : > { %465 = vadd.xlane.f32.xlu1 %v464_v62 }
 0x312   : > { %561 = vrot.lane.b32.xlu1 %v1988_v30, %s1835_s10  ;;  %s1845_s10 = smov 24  }
 0x38a   : > { %v469_v63 = vpop.xlane.xlu1 %468 }
 0x38b   : > { %1740 = vrcp.f32 %v469_v63 }
 0x38e   : > { %v466_v0 = vpop.xlane.xlu1 %465 }
 0x38f   : > { %1742 = vrcp.f32 %v466_v0 }
 0x392   : > { %v562_v5 = vpop.permute.xlu1 %561 }
 0x395   : > { %v1741_v1 = vpop.eup %1740 }
 0x396   : > { %v473_v4 = vmul.f32 %v1741_v1, %v1737_v59 }
 0x399   : > { %v1743_v2 = vpop.eup %1742 }
 0x39a   : > { %v472_v3 = vmul.f32 %v1743_v2, %v1739_v61 }
 0x39c   : > { %1506 = vmatprep.mubr.msk.f32.mxu1 %vm451_vm2, %v472_v3 }
 0x39d   : > { %1507 = vmatmul.mubr.msk.f32.vlgmr.msra.gmra.mrb[2].mxu1 %vm451_vm2, %v473_v4 }
 0x39e   : > { %1609 = vmatpush3.bf16.xpose.msk.msra.mxu1 %vm1999_vm1, %v1604_v58  ;;  %1513 = vmatprep.mubr.msk.f32.mxu1 %vm367_vm0, %v562_v5 }
 0x3a5   : > { %1514 = vmatmul.mubr.msk.f32.vlgmr.msra.gmra.mrb[4].mxu1 %vm367_vm0, %v564_v6 }
 0x470   : > { %v2031_v7 = vpop.f32.mrb[2].mxu1 }
 0x471   : > { %v2033_v8 = vpop.f32.mrb[3].mxu1 }
 0x478   : > { %v1515_v11 = vpop.f32.mrb[4].mxu1 }
 0x479   : > { %v649_v12 = vadd.f32 %v1515_v11, %v356_v9  ;;  %v643_v13 = vpop.f32.mrb[5].mxu1 }
 0x47a   : > { %v644_v14 = vadd.f32 %v643_v13, %v355_v10 }
 0x47b   : > { %v655_v15 = vsel %vm451_vm2, %v649_v12, -inf }
 0x47c   : > { %656 = vmax.xlane.f32.xlu0 %v655_v15  ;;  %v652_v16 = vsel %vm451_vm2, %v644_v14, -inf }
 0x47d   : > { %653 = vmax.xlane.f32.xlu1 %v652_v16 }
 0x48e   : > { %1712 = vrot.lane.b32.xlu1 %v1994_v31, %s1836_s17  ;;  %s1843_s17 = smov 40  }
 0x492   : > { %1717 = vrot.lane.b32.xlu0 %v1994_v31, %s1837_s15  ;;  %761 = vrot.lane.b32.xlu1 %v1988_v30, %s1838_s18  ;;  %s1844_s15 = smov 16  }
 0x509   : > { %v657_v17 = vpop.xlane.xlu0 %656 }
 0x50a   : > { %v659_v18 = vsub.f32 %v649_v12, %v657_v17  ;;  %v654_v19 = vpop.xlane.xlu1 %653 }
 0x50b   : > { %v658_v20 = vsub.f32 %v644_v14, %v654_v19 }
 0x50c   : > { %v662_v21 = vmul.f32 1.442695, %v659_v18 }
 0x50d   : > { %v660_v22 = vmul.f32 1.442695, %v658_v20  ;;  %v1718_v23 = vpop.permute.xlu0 %1717 }
 0x50e   : > { %1744 = vpow2.f32 %v662_v21  ;;  %v1713_v24 = vpop.permute.xlu1 %1712  ;;  %v1720_v25 = vunpack.i.h.bf16 %v1718_v23  ;;  %v1719_v26 = vunpack.i.l.bf16 %v1718_v23  ;;  %v360_v21 = vld [vmem:[%s2175_s3 + $0x38] sm:$0xff] }
 0x50f   : > { %v1715_v27 = vunpack.i.h.bf16 %v1713_v24  ;;  %v1714_v29 = vunpack.i.l.bf16 %v1713_v24  ;;  %1746 = vpow2.f32 %v660_v22  ;;  %v359_v22 = vld [vmem:[%s2175_s3 + $0x30] sm:$0xff] }
 0x510   : > { %v1614_v33 = vpack.c.bf16 %v1720_v25, %v1719_v26 }
 0x511   : > { %v1610_v32 = vpack.c.bf16 %v1715_v27, %v1714_v29 }
 0x512   : > { %v762_v39 = vpop.permute.xlu1 %761 }
 0x513   : > { %1611 = vmatprep.subr.bf16.mxu1 %v1610_v32 }
 0x514   : > { %1613 = vmatpush3.bf16.msra.mxu1 %v1610_v32 }
 0x515   : > { %1616 = vmatprep.subr.msk.bf16.mxu1 %vm1999_vm1, %v1614_v33 }
 0x518   : > { %v1745_v34 = vpop.eup %1744 }
 0x519   : > { %v667_v36 = vsel %vm451_vm2, %v1745_v34, 0.0  ;;  %v1747_v37 = vpop.eup %1746 }
 0x51a   : > { %668 = vadd.xlane.f32.xlu1 %v667_v36  ;;  %v664_v38 = vsel %vm451_vm2, %v1747_v37, 0.0 }
 0x51e   : > { %665 = vadd.xlane.f32.xlu1 %v664_v38 }
 0x52f   : > { %763 = vrot.lane.b32.xlu1 %v1986_v28, %s1838_s18 }
 0x5a7   : > { %v669_v40 = vpop.xlane.xlu1 %668 }
 0x5a8   : > { %1748 = vrcp.f32 %v669_v40 }
 0x5ab   : > { %v666_v41 = vpop.xlane.xlu1 %665 }
 0x5ac   : > { %1750 = vrcp.f32 %v666_v41 }
 0x5af   : > { %v764_v46 = vpop.permute.xlu1 %763 }
 0x5b2   : > { %v1749_v42 = vpop.eup %1748 }
 0x5b3   : > { %v673_v45 = vmul.f32 %v1749_v42, %v1745_v34 }
 0x5b6   : > { %v1751_v43 = vpop.eup %1750 }
 0x5b7   : > { %v672_v44 = vmul.f32 %v1751_v43, %v1747_v37 }
 0x5b9   : > { %1520 = vmatprep.mubr.msk.f32.mxu1 %vm451_vm2, %v672_v44 }
 0x5ba   : > { %1521 = vmatmul.mubr.msk.f32.vlgmr.msra.gmra.mrb[6].mxu1 %vm451_vm2, %v673_v45 }
 0x5bb   : > { %1619 = vmatpush3.bf16.xpose.msk.msra.mxu1 %vm1999_vm1, %v1614_v33  ;;  %1527 = vmatprep.mubr.msk.f32.mxu1 %vm367_vm0, %v762_v39 }
 0x5c2   : > { %1528 = vmatmul.mubr.msk.f32.vlgmr.msra.gmra.mrb[8].mxu1 %vm367_vm0, %v764_v46 }
 0x68d   : > { %v2057_v47 = vpop.f32.mrb[6].mxu1 }
 0x68e   : > { %v2059_v48 = vpop.f32.mrb[7].mxu1 }
 0x695   : > { %v1529_v51 = vpop.f32.mrb[8].mxu1 }
 0x696   : > { %v849_v52 = vadd.f32 %v1529_v51, %v358_v49  ;;  %v843_v53 = vpop.f32.mrb[9].mxu1 }
 0x697   : > { %v844_v54 = vadd.f32 %v843_v53, %v357_v50  ;;  %v1194_v53 = vld [vmem:[%s2176_s4 + $0x10] sm:$0xff] }
 0x698   : > { %v855_v55 = vsel %vm451_vm2, %v849_v52, -inf }
 0x699   : > { %856 = vmax.xlane.f32.xlu0 %v855_v55  ;;  %v852_v56 = vsel %vm451_vm2, %v844_v54, -inf  ;;  %v1195_v55 = vld [vmem:[%s2176_s4 + $0x18] sm:$0xff] }
 0x69a   : > { %853 = vmax.xlane.f32.xlu1 %v852_v56  ;;  %v1638_v56 = vpack.c.bf16 %v1195_v55, %v1194_v53 }
 0x726   : > { %v857_v57 = vpop.xlane.xlu0 %856 }
 0x727   : > { %v859_v58 = vsub.f32 %v849_v52, %v857_v57  ;;  %v854_v59 = vpop.xlane.xlu1 %853  ;;  %v1193_v52 = vld [vmem:[%s2176_s4 + $0x8] sm:$0xff] }
 0x728   : > { %v858_v60 = vsub.f32 %v844_v54, %v854_v59 }
 0x729   : > { %v862_v61 = vmul.f32 1.442695, %v859_v58 }
 0x72a   : > { %v860_v62 = vmul.f32 1.442695, %v858_v60 }
 0x72b   : > { %1752 = vpow2.f32 %v862_v61 }
 0x72c   : > { %1754 = vpow2.f32 %v860_v62 }
 0x735   : > { %v1753_v63 = vpop.eup %1752 }
 0x736   : > { %v1755_v0 = vpop.eup %1754  ;;  %v867_v1 = vsel %vm451_vm2, %v1753_v63, 0.0 }
 0x737   : > { %868 = vadd.xlane.f32.xlu1 %v867_v1  ;;  %v864_v2 = vsel %vm451_vm2, %v1755_v0, 0.0 }
 0x738   : > { %865 = vadd.xlane.f32.xlu0 %v864_v2 }
 0x748   : > { %1727 = vrot.lane.b32.xlu1 %v1994_v31, %s1839_s28  ;;  %s2130_s28 = scalar_lea.sflag [#allocation3], %s243_s11 }
 0x74c   : > { %961 = vrot.lane.b32.xlu1 %v1988_v30, %s1840_s29 }
 0x74e   : > { %1722 = vrot.lane.b32.xlu0 %v1994_v31, %s1841_s9  ;;  %s1772_s9 = sshll.u32 %s1846_s25, 4  ;;  %s1773_s9 = int_to_ptr.vmem [resolvable:$false] %s1772_s9 }
 0x752   : > { %963 = vrot.lane.b32.xlu0 %v1986_v28, %s1840_s29 }
 0x7c4   : > { %v869_v3 = vpop.xlane.xlu1 %868 }
 0x7c5   : > { %1756 = vrcp.f32 %v869_v3  ;;  %v866_v4 = vpop.xlane.xlu0 %865 }
 0x7c6   : > { %1758 = vrcp.f32 %v866_v4 }
 0x7c8   : > { %v1728_v5 = vpop.permute.xlu1 %1727 }
 0x7c9   : > { %v1723_v6 = vpop.permute.xlu0 %1722  ;;  %v1730_v9 = vunpack.i.h.bf16 %v1728_v5  ;;  %v1729_v10 = vunpack.i.l.bf16 %v1728_v5 }
 0x7ca   : > { %v1725_v11 = vunpack.i.h.bf16 %v1723_v6  ;;  %v1724_v12 = vunpack.i.l.bf16 %v1723_v6 }
 0x7cb   : > { %v1624_v14 = vpack.c.bf16 %v1730_v9, %v1729_v10 }
 0x7cc   : > { %v1620_v13 = vpack.c.bf16 %v1725_v11, %v1724_v12  ;;  %v962_v17 = vpop.permute.xlu1 %961 }
 0x7cd   : > { %v964_v18 = vpop.permute.xlu0 %963 }
 0x7ce   : > { %1621 = vmatprep.subr.bf16.mxu1 %v1620_v13 }
 0x7cf   : > { %v1757_v15 = vpop.eup %1756  ;;  %1623 = vmatpush3.bf16.msra.mxu1 %v1620_v13 }
 0x7d0   : > { %v1759_v30 = vpop.eup %1758  ;;  %1626 = vmatprep.subr.msk.bf16.mxu1 %vm1999_vm1, %v1624_v14  ;;  %v873_v16 = vmul.f32 %v1757_v15, %v1753_v63 }
 0x7d1   : > { %v872_v28 = vmul.f32 %v1759_v30, %v1755_v0 }
 0x7d3   : > { %1534 = vmatprep.mubr.msk.f32.mxu1 %vm451_vm2, %v872_v28 }
 0x7d4   : > { %1535 = vmatmul.mubr.msk.f32.vlgmr.msra.gmra.mrb[10].mxu1 %vm451_vm2, %v873_v16 }
 0x7d5   : > { %1541 = vmatprep.mubr.msk.f32.mxu1 %vm367_vm0, %v962_v17 }
 0x7d8   : > { %1629 = vmatpush3.bf16.xpose.msk.msra.mxu1 %vm1999_vm1, %v1624_v14 }
 0x7df   : > { %1542 = vmatmul.mubr.msk.f32.vlgmr.msra.gmra.mrb[12].mxu1 %vm367_vm0, %v964_v18 }
 0x8a7   : > { %v1536_v19 = vpop.f32.mrb[10].mxu1 }
 0x8a8   : > { %v952_v20 = vpop.f32.mrb[11].mxu1 }
 0x8b2   : > { %v1543_v23 = vpop.f32.mrb[12].mxu1 }
 0x8b3   : > { %v1049_v24 = vadd.f32 %v1543_v23, %v360_v21  ;;  %v1043_v25 = vpop.f32.mrb[13].mxu1 }
 0x8b4   : > { %v1044_v26 = vadd.f32 %v1043_v25, %v359_v22 }
 0x8b5   : > { %v1055_v35 = vsel %vm451_vm2, %v1049_v24, -inf }
 0x8b6   : > { %1056 = vmax.xlane.f32.xlu0 %v1055_v35  ;;  %v1052_v27 = vsel %vm451_vm2, %v1044_v26, -inf }
 0x8b7   : > { %1053 = vmax.xlane.f32.xlu1 %v1052_v27 }
 0x943   : > { %v1057_v29 = vpop.xlane.xlu0 %1056 }
 0x944   : > { %v1059_v32 = vsub.f32 %v1049_v24, %v1057_v29  ;;  %v1054_v33 = vpop.xlane.xlu1 %1053 }
 0x945   : > { %v1058_v34 = vsub.f32 %v1044_v26, %v1054_v33 }
 0x946   : > { %v1062_v36 = vmul.f32 1.442695, %v1059_v32 }
 0x947   : > { %v1060_v37 = vmul.f32 1.442695, %v1058_v34 }
 0x948   : > { %1760 = vpow2.f32 %v1062_v36 }
 0x949   : > { %1762 = vpow2.f32 %v1060_v37 }
 0x952   : > { %v1761_v38 = vpop.eup %1760 }
 0x953   : > { %v1763_v39 = vpop.eup %1762  ;;  %v1067_v40 = vsel %vm451_vm2, %v1761_v38, 0.0 }
 0x954   : > { %1068 = vadd.xlane.f32.xlu1 %v1067_v40  ;;  %v1064_v41 = vsel %vm451_vm2, %v1763_v39, 0.0 }
 0x955   : > { %1065 = vadd.xlane.f32.xlu0 %v1064_v41 }
 0x965   : > { %1163 = vrot.lane.b32.xlu1 %v2059_v48, %s1842_s16 }
 0x969   : > { %1165 = vrot.lane.b32.xlu1 %v2057_v47, %s1842_s16 }
 0x96b   : > { %1732 = vrot.lane.b32.xlu0 %v1994_v31, %s1843_s17  ;;  %v1192_v31 = vld [vmem:[%s2176_s4] sm:$0xff] }
 0x96c   : > { %v1634_v54 = vpack.c.bf16 %v1193_v52, %v1192_v31 }
 0x96d   : > { %1173 = vrot.lane.b32.xlu1 %v1536_v19, %s1844_s15 }
 0x96f   : > { %1171 = vrot.lane.b32.xlu0 %v952_v20, %s1844_s15  ;;  %s245_s15 = scalar_lea.vmem [#allocation2], %s1367_s12 }
 0x970   : > { %s1301_s18 = sshll.u32 %s245_s15, 4  ;;  %s2123_s18 = int_to_ptr.vmem [resolvable:$true] %s1301_s18 }
 0x971   : > { %s1768_s29 = scalar_lea.vmem %s2123_s18, 256  ;;  %p1775_p0 = scmp.lt.s32.totalorder %s2123_s18, %s1773_s9 }
 0x972   : > { %p1769_p11 = scmp.ne.s32.totalorder %s2123_s18, %s1768_s29 }
 0x974   : > { %p1770_p12 = pnand %p1769_p11, %p1921_p5 }
 0x976   : > { %p1771_p13 = pneg %p1770_p12 }
 0x9e1   : > { %v1069_v42 = vpop.xlane.xlu1 %1068 }
 0x9e2   : > { %1764 = vrcp.f32 %v1069_v42  ;;  %v1066_v43 = vpop.xlane.xlu0 %1065 }
 0x9e3   : > { %1766 = vrcp.f32 %v1066_v43 }
 0x9e5   : > { %v1164_v59 = vpop.permute.xlu1 %1163 }
 0x9e6   : > { %v1733_v44 = vpop.permute.xlu0 %1732  ;;  %v1185_v63 = vsel %vm367_vm0, %v2033_v8, %v1164_v59  ;;  %v1395_v8 = vld [vmem:[%s2177_s5] ss:$0 sm:$0xff] }
 0x9e7   : > { %v1735_v45 = vunpack.i.h.bf16 %v1733_v44  ;;  %v1734_v46 = vunpack.i.l.bf16 %v1733_v44 }
 0x9e9   : > { %v1630_v49 = vpack.c.bf16 %v1735_v45, %v1734_v46  ;;  %v1166_v60 = vpop.permute.xlu1 %1165 }
 0x9ea   : > { %v1172_v62 = vpop.permute.xlu0 %1171  ;;  %v1186_v1 = vsel %vm367_vm0, %v2031_v7, %v1166_v60 }
 0x9eb   : > { %1631 = vmatprep.subr.bf16.mxu0 %v1630_v49  ;;  %v1187_v2 = vsel %vm451_vm2, %v1185_v63, %v1172_v62 }
 0x9ec   : > { %v1765_v50 = vpop.eup %1764  ;;  %1633 = vmatpush3.bf16.msra.mxu0 %v1630_v49 }
 0x9ed   : > { %v1767_v48 = vpop.eup %1766  ;;  %v1073_v47 = vmul.f32 %v1765_v50, %v1761_v38  ;;  %1635 = vmatprep.subr.bf16.mxu0 %v1634_v54  ;;  %v1174_v61 = vpop.permute.xlu1 %1173 }
 0x9ee   : > { %v1072_v51 = vmul.f32 %v1767_v48, %v1763_v39  ;;  %v1188_v4 = vsel %vm451_vm2, %v1186_v1, %v1174_v61 }
 0x9f0   : > { %1548 = vmatprep.mubr.msk.f32.mxu0 %vm451_vm2, %v1072_v51 }
 0x9f1   : > { %1549 = vmatmul.mubr.msk.f32.vlgmr.msra.gmra.mrb[2].mxu0 %vm451_vm2, %v1073_v47 }
 0x9f2   : > { %1637 = vmatpush3.bf16.msra.mxu0 %v1634_v54 }
 0x9f3   : > { %1639 = vmatprep.subr.bf16.mxu0 %v1638_v56 }
 0x9f6   : > { %1641 = vmatpush3.bf16.msra.mxu0 %v1638_v56 }
 0xac4   : > { %v1550_v57 = vpop.f32.mrb[2].mxu0 }
 0xac5   : > { %1181 = vrot.lane.b32.xlu1 %v1550_v57, %s1845_s10  ;;  %v1152_v58 = vpop.f32.mrb[3].mxu0 }
 0xac6   : > { %1179 = vrot.lane.b32.xlu0 %v1152_v58, %s1845_s10  ;;  %s1774_s10 = scalar_lea.vmem %s1773_s9, 512 }
 0xac7   : > { %p1776_p1 = scmp.lt.s32.totalorder %s1774_s10, %s1768_s29 }
 0xac9   : > { %p1777_p2 = por %p1776_p1, %p1775_p0 }
 0xacb   : > { %p1778_p3 = pnand %p1777_p2, %p1771_p13 }
 0xb37   : > { %v1182_v0 = vpop.permute.xlu1 %1181 }
 0xb38   : > { %v1180_v3 = vpop.permute.xlu0 %1179  ;;  %v1191_v6 = vsel %vm1189_vm3, %v1188_v4, %v1182_v0 }
 0xb39   : > { %v1190_v5 = vsel %vm1189_vm3, %v1187_v2, %v1180_v3 }
 0xb3a   : > { %1559 = vmatprep.mubr.msk.f32.mxu0 %vm1203_vm4, %v1190_v5 }
 0xb3b   : > { %1560 = vmatmul.mubr.msk.f32.vlgmr.msra.gmra.mrb[4].mxu0 %vm1203_vm4, %v1191_v6 }
 0xc0e   : > { %v1561_v7 = vpop.f32.mrb[4].mxu0 }
 0xc0f   : > { %v1282_v9 = vadd.f32 %v1561_v7, %v1395_v8  ;;  %v1276_v10 = vpop.f32.mrb[5].mxu0 }
 0xc10   : > { %v1277_v11 = vadd.f32 %v1395_v8, %v1276_v10 }
 0xc11   : > { %1286 = vst [vmem:[%s245_s15 + $0x8] sm:$0xff] %v1282_v9 }
 0xc12   : > { %1285 = vst [vmem:[%s245_s15] sm:$0xff] %v1277_v11 }
 0xc13   : > { %1781 = shalt.err (!%p1778_p3)
}
 0xc14   : > { %s1782_s11 = scalar_lea.hbm %s2128_s26, 256  ;;  %s1786_s17 = scalar_lea.hbm %s2178_s6, 512 }
 0xc15   : > { %p1783_p4 = scmp.ne.s32.totalorder %s2128_s26, %s1782_s11  ;;  %p1787_p9 = scmp.lt.u32.totalorder %s2128_s26, %s2178_s6 }
 0xc16   : > { %p1788_p10 = scmp.lt.u32.totalorder %s1786_s17, %s1782_s11  ;;  %p1790_p12 = scmp.lt.u32.totalorder %s1782_s11, %s2128_s26 }
 0xc17   : > { %p1784_p7 = pnand %p1783_p4, %p1921_p5 }
 0xc18   : > { %p1789_p11 = por %p1788_p10, %p1787_p9 }
 0xc19   : > { %p1785_p8 = pneg %p1784_p7 }
 0xc1a   : > { %p1791_p13 = por %p1790_p12, %p1789_p11 }
 0xc1c   : > { %p1792_p0 = pnand %p1791_p13, %p1785_p8 }
 0xc1e   : > { %1795 = shalt.err (!%p1792_p0)
}
 0xc1f   : > { %s1847_s19 = smov 128  }
 0xc20   : > { %1642 = dma.vmem_to_hbm [thread:$0]  (%p1921_p5), %s2123_s18, 256, %s2128_s26, %s2130_s28, %s1847_s19, %s1847_s19, %s1842_s16  }
 0xc21 PF: > { %p1648_p1 = scmp.ge.s32.totalorder %s1830_s24, 2  ;;  %s1316_s20 = sand.u32 1, %s1818_s21  }
 0xc22   : > { %s1317_s29 = scalar_lea.sflag [#allocation3], %s1316_s20 }
 0xc23   : > { %p1645_p2 = pnand %p1648_p1, %p1925_p6 }
 0xc25   : > { %1813 = dma.done.wait (!%p1645_p2), %s1317_s29, 256  }
 0xc26   : > { %1815 = vsyncadd (!%p1645_p2), %s1317_s29, 4294967040  ;;  %p16_p3 = scmp.ge.s32.totalorder %s1908_s27, 4   ;;  %s2183_s21 = smov %s1822_s22 }
 0xc27   : > { %s2184_s22 = smov %s1826_s23  ;;  %s2185_s23 = smov %s1919_s30 }
 0xc28   : > { %s2186_s24 = smov %s1908_s27  ;;  %18 = sbr.rel (!%p16_p3) target bundleno = 3 (0x3), region = 79 }
 0xc2f   :  { %1322 = vsyncpa [#allocation3], 1 }
 0xc30   :  { %1324 = vsyncpa [#allocation3 + $0x1], 1 }

</bundles_post_ra>
